<compile_context>
chip_gen: v5e
topology: v5e:2x2
jax: 0.10.0
libtpu: 0.0.40
codegen_flags: <defaults>
</compile_context>

<pallas_src>
import jax
import jax.numpy as jnp
from jax.experimental import pallas as pl
from jax.experimental.pallas import tpu as pltpu


def _nstd_1lin_kernel(x_ref, wt_ref, b_ref, o_ref):
    """Grid axis 0 tiles the reduction (feature) dimension D."""

    @pl.when(pl.program_id(0) == 0)
    def _():
        # Seed the resident output block with the bias (added exactly once).
        o_ref[...] = jnp.broadcast_to(b_ref[...].astype(jnp.float32), o_ref.shape)

    o_ref[...] += jnp.dot(
        x_ref[...], wt_ref[...], preferred_element_type=jnp.float32
    )


def _pick_k_tile(d, tk_max=4096):
    """Largest multiple of 128 that divides d and is <= tk_max (None if d % 128)."""
    if d % 128 != 0:
        return None
    tk = 128
    cand = 128
    while cand <= min(d, tk_max):
        if d % cand == 0:
            tk = cand
        cand += 128
    return tk


def nstd_1lin_forward(x, weight, bias):
    """x: (b, ts, C, H, W) or (b, C, H, W); weight: (num_classes, D); bias: (num_classes,)."""
    if x.ndim < 5:
        x = x[:, None]                     # unsqueeze(1) -> ts = 1
    b, ts, c, h, w = x.shape
    num_classes, d = weight.shape
    assert c * h * w == d, "fc in_features must equal C*H*W"
    ii = ts // 2                           # int(ts / 2) in the PyTorch module

    wt = weight.T                          # (D, num_classes)
    bias2d = bias.reshape(1, num_classes)

    tk = _pick_k_tile(d)
    if tk is not None:
        # Zero-copy reshape; the index_map selects the middle frame's columns,
        # so only that frame is ever DMA'd from HBM.
        x_in = x.reshape(b, ts * d)
        blocks_per_frame = d // tk
        x_spec = pl.BlockSpec((b, tk), lambda k: (0, ii * blocks_per_frame + k))
    else:
        # D not lane-aligned: slice just the middle frame on the host (copies
        # only that single frame) and use one full-width block.
        tk = d
        x_in = x[:, ii].reshape(b, d)
        x_spec = pl.BlockSpec((b, d), lambda k: (0, k))

    grid = (d // tk,)

    out = pl.pallas_call(
        _nstd_1lin_kernel,
        out_shape=jax.ShapeDtypeStruct((b, num_classes), jnp.float32),
        grid_spec=pltpu.PrefetchScalarGridSpec(
            num_scalar_prefetch=0,
            grid=grid,
            in_specs=[
                x_spec,
                # weight tile for this K block; resident lane dim = num_classes
                pl.BlockSpec((tk, num_classes), lambda k: (k, 0)),
                # bias row, resident across the whole grid
                pl.BlockSpec((1, num_classes), lambda k: (0, 0)),
            ],
            out_specs=pl.BlockSpec((b, num_classes), lambda k: (0, 0)),
        ),
        compiler_params=pltpu.CompilerParams(
            dimension_semantics=("arbitrary",),   # K is a reduction axis
        ),
    )(x_in, wt, bias2d)
    return out


def nstd_1lin_reference(x, weight, bias):
    """Pure-JAX reference mirroring the PyTorch forward."""
    if x.ndim < 5:
        x = x[:, None]
    b, ts = x.shape[:2]
    ii = ts // 2
    frame = x[:, ii].reshape(b, -1)
    return frame @ weight.T + bias


if __name__ == "__main__":
    # Shapes consistent with the module: fc = Linear(64*64, num_classes) => D = 4096.
    batch, ts, C, H, W = 2, 4, 1, 64, 64
    num_classes = 8
    D = C * H * W

    key = jax.random.PRNGKey(0)
    kx, kw, kb = jax.random.split(key, 3)

    x = jax.random.normal(kx, (batch, ts, C, H, W), dtype=jnp.float32)
    # Deterministic synthetic Linear params (PyTorch-style uniform scale).
    bound = 1.0 / (D ** 0.5)
    weight = jax.random.uniform(kw, (num_classes, D), jnp.float32, -bound, bound)
    bias = jax.random.uniform(kb, (num_classes,), jnp.float32, -bound, bound)

    # 5-D input path (ts > 1, middle frame selected)
    out = jax.block_until_ready(nstd_1lin_forward(x, weight, bias))
    ref = nstd_1lin_reference(x, weight, bias)
    assert out.shape == (batch, num_classes)
    assert jnp.allclose(out, ref, atol=1e-4, rtol=1e-4), (out, ref)

    # 4-D input path (unsqueeze(1) -> ts = 1, ii = 0)
    x4 = x[:, 0]
    out4 = jax.block_until_ready(nstd_1lin_forward(x4, weight, bias))
    ref4 = nstd_1lin_reference(x4, weight, bias)
    assert jnp.allclose(out4, ref4, atol=1e-4, rtol=1e-4), (out4, ref4)

    print("KERNEL_OK")
</pallas_src>

<mosaic_0001>
module attributes {stable_mosaic.version = 11 : i64} {
  func.func @_nstd_1lin_kernel(%arg0: i32, %arg1: memref<2x4096xf32, #tpu.memory_space<vmem>>, %arg2: memref<4096x8xf32, #tpu.memory_space<vmem>>, %arg3: memref<1x8xf32, #tpu.memory_space<vmem>>, %arg4: memref<2x8xf32, #tpu.memory_space<vmem>>) attributes {dimension_semantics = [#tpu.dimension_semantics<arbitrary>], iteration_bounds = array<i64: 1>, scalar_prefetch = 0 : i64, scratch_operands = 0 : i64, tpu.core_type = #tpu.core_type<tc>, window_params = [{transform_indices = @transform_0, window_bounds = array<i64: 2, 4096>}, {transform_indices = @transform_1, window_bounds = array<i64: 4096, 8>}, {pipeline_mode = #tpu.pipeline_mode<synchronous>, transform_indices = @transform_2, window_bounds = array<i64: 1, 8>}, {pipeline_mode = #tpu.pipeline_mode<synchronous>, transform_indices = @transform_3, window_bounds = array<i64: 2, 8>}]} {
    %c0_i32 = arith.constant 0 : i32
    %0 = arith.cmpi eq, %arg0, %c0_i32 : i32
    %1 = arith.extui %0 : i1 to i32
    %c0_i32_0 = arith.constant 0 : i32
    %2 = arith.cmpi ne, %1, %c0_i32_0 : i32
    scf.if %2 {
      %c0_8 = arith.constant 0 : index
      %c0_9 = arith.constant 0 : index
      %9 = vector.load %arg3[%c0_8, %c0_9] : memref<1x8xf32, #tpu.memory_space<vmem>>, vector<1x8xf32>
      %10 = vector.shape_cast %9 : vector<1x8xf32> to vector<1x8xf32>
      %11 = vector.broadcast %10 : vector<1x8xf32> to vector<2x8xf32>
      %c0_10 = arith.constant 0 : index
      %c0_11 = arith.constant 0 : index
      %12 = vector.load %arg4[%c0_10, %c0_11] : memref<2x8xf32, #tpu.memory_space<vmem>>, vector<2x8xf32>
      tpu.vector_store %arg4[%c0_10, %c0_11], %11 {strides = array<i32>} : memref<2x8xf32, #tpu.memory_space<vmem>>, vector<2x8xf32>,
    } else {
    }
    %c0 = arith.constant 0 : index
    %c0_1 = arith.constant 0 : index
    %3 = vector.load %arg4[%c0, %c0_1] : memref<2x8xf32, #tpu.memory_space<vmem>>, vector<2x8xf32>
    %c0_2 = arith.constant 0 : index
    %c0_3 = arith.constant 0 : index
    %4 = vector.load %arg1[%c0_2, %c0_3] : memref<2x4096xf32, #tpu.memory_space<vmem>>, vector<2x4096xf32>
    %c0_4 = arith.constant 0 : index
    %c0_5 = arith.constant 0 : index
    %5 = vector.load %arg2[%c0_4, %c0_5] : memref<4096x8xf32, #tpu.memory_space<vmem>>, vector<4096x8xf32>
    %cst = arith.constant dense<0.000000e+00> : vector<2x8xf32>
    %6 = tpu.matmul %4, %5, %cst {dimension_numbers = #tpu.dot_dimension_numbers<[1], [0], [0], [1], [0, 0, 1, 1], [], []>} : vector<2x4096xf32>, vector<4096x8xf32>, vector<2x8xf32> -> vector<2x8xf32>
    %7 = arith.addf %3, %6 : vector<2x8xf32>
    %c0_6 = arith.constant 0 : index
    %c0_7 = arith.constant 0 : index
    %8 = vector.load %arg4[%c0_6, %c0_7] : memref<2x8xf32, #tpu.memory_space<vmem>>, vector<2x8xf32>
    tpu.vector_store %arg4[%c0_6, %c0_7], %7 {strides = array<i32>} : memref<2x8xf32, #tpu.memory_space<vmem>>, vector<2x8xf32>,
    return
  }
  func.func @transform_0(%arg0: i32) -> (i32, i32) {
    %c2_i32 = arith.constant 2 : i32
    %0 = arith.addi %c2_i32, %arg0 : i32
    %c0_i32 = arith.constant 0 : i32
    %c0_i32_0 = arith.constant 0 : i32
    return %c0_i32, %0 : i32, i32
  }
  func.func @transform_1(%arg0: i32) -> (i32, i32) {
    %c0_i32 = arith.constant 0 : i32
    %c0_i32_0 = arith.constant 0 : i32
    return %arg0, %c0_i32 : i32, i32
  }
  func.func @transform_2(%arg0: i32) -> (i32, i32) {
    %c0_i32 = arith.constant 0 : i32
    %c0_i32_0 = arith.constant 0 : i32
    %c0_i32_1 = arith.constant 0 : i32
    return %c0_i32, %c0_i32_0 : i32, i32
  }
  func.func @transform_3(%arg0: i32) -> (i32, i32) {
    %c0_i32 = arith.constant 0 : i32
    %c0_i32_0 = arith.constant 0 : i32
    %c0_i32_1 = arith.constant 0 : i32
    return %c0_i32, %c0_i32_0 : i32, i32
  }
}

</mosaic_0001>

<bundles_post_ra>
// kernel: tpu_custom_call.1
= control target key start
LH: loop header
LB: loop body
LE: loop exit
PB: predicated region body
PF: predicated region fallthrough
CT: control target
= control target key end

     0   :  { %s2984_s0 = inlined_call_operand.vmem [shape: f32[2,16384], index: 0, kind: input, shape index: {}]   ;;  %s2985_s1 = inlined_call_operand.vmem [shape: f32[4096,8], index: 1, kind: input, shape index: {}]   ;;  %s2986_s2 = inlined_call_operand.vmem [shape: f32[1,8], index: 2, kind: input, shape index: {}]   ;;  %s2987_s3 = inlined_call_operand.hbm [shape: f32[2,8], index: 3, kind: output, shape index: {}]  }
   0x1   :  { %v71_v0 = vld [vmem:[%s2985_s1 + $0x78] sm:$0xff]  ;;  %v70_v2 = vld [vmem:[%s2985_s1 + $0x70] sm:$0xff]  ;;  %v69_v6 = vld [vmem:[%s2985_s1 + $0x68] sm:$0xff] }
   0x2   :  { %v103_v1 = vld [vmem:[%s2985_s1 + $0x178] sm:$0xff]  ;;  %649 = vmatpush.msra.mxu0 %v71_v0  ;;  %v102_v4 = vld [vmem:[%s2985_s1 + $0x170] sm:$0xff]  ;;  %v101_v8 = vld [vmem:[%s2985_s1 + $0x168] sm:$0xff] }
   0x3   :  { %689 = vmatpush.msra.mxu2 %v103_v1  ;;  %v87_v3 = vld [vmem:[%s2985_s1 + $0xf8] sm:$0xff]  ;;  %v86_v7 = vld [vmem:[%s2985_s1 + $0xf0] sm:$0xff]  ;;  %v85_v10 = vld [vmem:[%s2985_s1 + $0xe8] sm:$0xff] }
   0x4   :  { %v119_v5 = vld [vmem:[%s2985_s1 + $0x1f8] sm:$0xff]  ;;  %669 = vmatpush.msra.mxu1 %v87_v3  ;;  %650 = vmatpush.msra.mxu0 %v70_v2  ;;  %v118_v9 = vld [vmem:[%s2985_s1 + $0x1f0] sm:$0xff]  ;;  %v68_v11 = vld [vmem:[%s2985_s1 + $0x60] sm:$0xff] }
   0x5   :  { %709 = vmatpush.msra.mxu3 %v119_v5  ;;  %690 = vmatpush.msra.mxu2 %v102_v4  ;;  %v100_v12 = vld [vmem:[%s2985_s1 + $0x160] sm:$0xff]  ;;  %v117_v13 = vld [vmem:[%s2985_s1 + $0x1e8] sm:$0xff]  ;;  %v67_v16 = vld [vmem:[%s2985_s1 + $0x58] sm:$0xff] }
   0x6   :  { %670 = vmatpush.msra.mxu1 %v86_v7  ;;  %651 = vmatpush.msra.mxu0 %v69_v6  ;;  %v84_v14 = vld [vmem:[%s2985_s1 + $0xe0] sm:$0xff]  ;;  %v99_v17 = vld [vmem:[%s2985_s1 + $0x158] sm:$0xff]  ;;  %v66_v20 = vld [vmem:[%s2985_s1 + $0x50] sm:$0xff] }
   0x7   :  { %710 = vmatpush.msra.mxu3 %v118_v9  ;;  %691 = vmatpush.msra.mxu2 %v101_v8  ;;  %v116_v15 = vld [vmem:[%s2985_s1 + $0x1e0] sm:$0xff]  ;;  %v83_v18 = vld [vmem:[%s2985_s1 + $0xd8] sm:$0xff]  ;;  %v98_v21 = vld [vmem:[%s2985_s1 + $0x150] sm:$0xff] }
   0x8   :  { %671 = vmatpush.msra.mxu1 %v85_v10  ;;  %652 = vmatpush.msra.mxu0 %v68_v11  ;;  %v115_v19 = vld [vmem:[%s2985_s1 + $0x1d8] sm:$0xff]  ;;  %v82_v22 = vld [vmem:[%s2985_s1 + $0xd0] sm:$0xff]  ;;  %v65_v24 = vld [vmem:[%s2985_s1 + $0x48] sm:$0xff] }
   0x9   :  { %711 = vmatpush.msra.mxu3 %v117_v13  ;;  %692 = vmatpush.msra.mxu2 %v100_v12  ;;  %v114_v23 = vld [vmem:[%s2985_s1 + $0x1d0] sm:$0xff]  ;;  %v97_v25 = vld [vmem:[%s2985_s1 + $0x148] sm:$0xff]  ;;  %v64_v28 = vld [vmem:[%s2985_s1 + $0x40] sm:$0xff] }
   0xa   :  { %672 = vmatpush.msra.mxu1 %v84_v14  ;;  %653 = vmatpush.msra.mxu0 %v67_v16  ;;  %v81_v26 = vld [vmem:[%s2985_s1 + $0xc8] sm:$0xff]  ;;  %v96_v29 = vld [vmem:[%s2985_s1 + $0x140] sm:$0xff]  ;;  %v63_v32 = vld [vmem:[%s2985_s1 + $0x38] sm:$0xff] }
   0xb   :  { %712 = vmatpush.msra.mxu3 %v116_v15  ;;  %693 = vmatpush.msra.mxu2 %v99_v17  ;;  %v113_v27 = vld [vmem:[%s2985_s1 + $0x1c8] sm:$0xff]  ;;  %v80_v30 = vld [vmem:[%s2985_s1 + $0xc0] sm:$0xff]  ;;  %v95_v33 = vld [vmem:[%s2985_s1 + $0x138] sm:$0xff] }
   0xc   :  { %673 = vmatpush.msra.mxu1 %v83_v18  ;;  %654 = vmatpush.msra.mxu0 %v66_v20  ;;  %v112_v31 = vld [vmem:[%s2985_s1 + $0x1c0] sm:$0xff]  ;;  %v79_v34 = vld [vmem:[%s2985_s1 + $0xb8] sm:$0xff]  ;;  %v62_v36 = vld [vmem:[%s2985_s1 + $0x30] sm:$0xff] }
   0xd   :  { %713 = vmatpush.msra.mxu3 %v115_v19  ;;  %694 = vmatpush.msra.mxu2 %v98_v21  ;;  %v111_v35 = vld [vmem:[%s2985_s1 + $0x1b8] sm:$0xff]  ;;  %v94_v37 = vld [vmem:[%s2985_s1 + $0x130] sm:$0xff]  ;;  %v61_v40 = vld [vmem:[%s2985_s1 + $0x28] sm:$0xff] }
   0xe   :  { %674 = vmatpush.msra.mxu1 %v82_v22  ;;  %655 = vmatpush.msra.mxu0 %v65_v24  ;;  %v78_v38 = vld [vmem:[%s2985_s1 + $0xb0] sm:$0xff]  ;;  %v93_v41 = vld [vmem:[%s2985_s1 + $0x128] sm:$0xff]  ;;  %v60_v44 = vld [vmem:[%s2985_s1 + $0x20] sm:$0xff] }
   0xf   :  { %714 = vmatpush.msra.mxu3 %v114_v23  ;;  %695 = vmatpush.msra.mxu2 %v97_v25  ;;  %v110_v39 = vld [vmem:[%s2985_s1 + $0x1b0] sm:$0xff]  ;;  %v77_v42 = vld [vmem:[%s2985_s1 + $0xa8] sm:$0xff]  ;;  %v92_v45 = vld [vmem:[%s2985_s1 + $0x120] sm:$0xff] }
  0x10   :  { %675 = vmatpush.msra.mxu1 %v81_v26  ;;  %656 = vmatpush.msra.mxu0 %v64_v28  ;;  %v109_v43 = vld [vmem:[%s2985_s1 + $0x1a8] sm:$0xff]  ;;  %v76_v46 = vld [vmem:[%s2985_s1 + $0xa0] sm:$0xff]  ;;  %v59_v48 = vld [vmem:[%s2985_s1 + $0x18] sm:$0xff] }
  0x11   :  { %715 = vmatpush.msra.mxu3 %v113_v27  ;;  %696 = vmatpush.msra.mxu2 %v96_v29  ;;  %v108_v47 = vld [vmem:[%s2985_s1 + $0x1a0] sm:$0xff]  ;;  %v91_v49 = vld [vmem:[%s2985_s1 + $0x118] sm:$0xff]  ;;  %v58_v52 = vld [vmem:[%s2985_s1 + $0x10] sm:$0xff] }
  0x12   :  { %676 = vmatpush.msra.mxu1 %v80_v30  ;;  %657 = vmatpush.msra.mxu0 %v63_v32  ;;  %v75_v50 = vld [vmem:[%s2985_s1 + $0x98] sm:$0xff]  ;;  %v90_v53 = vld [vmem:[%s2985_s1 + $0x110] sm:$0xff]  ;;  %v57_v56 = vld [vmem:[%s2985_s1 + $0x8] sm:$0xff] }
  0x13   :  { %716 = vmatpush.msra.mxu3 %v112_v31  ;;  %697 = vmatpush.msra.mxu2 %v95_v33  ;;  %v107_v51 = vld [vmem:[%s2985_s1 + $0x198] sm:$0xff]  ;;  %v74_v54 = vld [vmem:[%s2985_s1 + $0x90] sm:$0xff]  ;;  %v89_v57 = vld [vmem:[%s2985_s1 + $0x108] sm:$0xff] }
  0x14   :  { %677 = vmatpush.msra.mxu1 %v79_v34  ;;  %658 = vmatpush.msra.mxu0 %v62_v36  ;;  %v106_v55 = vld [vmem:[%s2985_s1 + $0x190] sm:$0xff]  ;;  %v73_v58 = vld [vmem:[%s2985_s1 + $0x88] sm:$0xff]  ;;  %v56_v60 = vld [vmem:[%s2985_s1] sm:$0xff] }
  0x15   :  { %717 = vmatpush.msra.mxu3 %v111_v35  ;;  %698 = vmatpush.msra.mxu2 %v94_v37  ;;  %v105_v59 = vld [vmem:[%s2985_s1 + $0x188] sm:$0xff]  ;;  %v88_v61 = vld [vmem:[%s2985_s1 + $0x100] sm:$0xff]  ;;  %v135_v62 = vld [vmem:[%s2985_s1 + $0x278] sm:$0xff] }
  0x16   :  { %678 = vmatpush.msra.mxu1 %v78_v38  ;;  %659 = vmatpush.msra.mxu0 %v61_v40  ;;  %v167_v63 = vld [vmem:[%s2985_s1 + $0x378] sm:$0xff]  ;;  %v72_v0 = vld [vmem:[%s2985_s1 + $0x80] sm:$0xff]  ;;  %v134_v2 = vld [vmem:[%s2985_s1 + $0x270] sm:$0xff] }
  0x17   :  { %718 = vmatpush.msra.mxu3 %v110_v39  ;;  %699 = vmatpush.msra.mxu2 %v93_v41  ;;  %v104_v1 = vld [vmem:[%s2985_s1 + $0x180] sm:$0xff]  ;;  %v151_v3 = vld [vmem:[%s2985_s1 + $0x2f8] sm:$0xff]  ;;  %v166_v4 = vld [vmem:[%s2985_s1 + $0x370] sm:$0xff] }
  0x18   :  { %679 = vmatpush.msra.mxu1 %v77_v42  ;;  %660 = vmatpush.msra.mxu0 %v60_v44  ;;  %v183_v5 = vld [vmem:[%s2985_s1 + $0x3f8] sm:$0xff]  ;;  %v133_v6 = vld [vmem:[%s2985_s1 + $0x268] sm:$0xff]  ;;  %v150_v7 = vld [vmem:[%s2985_s1 + $0x2f0] sm:$0xff] }
  0x19   :  { %719 = vmatpush.msra.mxu3 %v109_v43  ;;  %700 = vmatpush.msra.mxu2 %v92_v45  ;;  %v165_v8 = vld [vmem:[%s2985_s1 + $0x368] sm:$0xff]  ;;  %v182_v9 = vld [vmem:[%s2985_s1 + $0x3f0] sm:$0xff]  ;;  %v132_v10 = vld [vmem:[%s2985_s1 + $0x260] sm:$0xff] }
  0x1a   :  { %680 = vmatpush.msra.mxu1 %v76_v46  ;;  %661 = vmatpush.msra.mxu0 %v59_v48  ;;  %v149_v11 = vld [vmem:[%s2985_s1 + $0x2e8] sm:$0xff]  ;;  %v164_v12 = vld [vmem:[%s2985_s1 + $0x360] sm:$0xff]  ;;  %v131_v14 = vld [vmem:[%s2985_s1 + $0x258] sm:$0xff] }
  0x1b   :  { %720 = vmatpush.msra.mxu3 %v108_v47  ;;  %701 = vmatpush.msra.mxu2 %v91_v49  ;;  %v181_v13 = vld [vmem:[%s2985_s1 + $0x3e8] sm:$0xff]  ;;  %v148_v15 = vld [vmem:[%s2985_s1 + $0x2e0] sm:$0xff]  ;;  %v163_v16 = vld [vmem:[%s2985_s1 + $0x358] sm:$0xff] }
  0x1c   :  { %681 = vmatpush.msra.mxu1 %v75_v50  ;;  %662 = vmatpush.msra.mxu0 %v58_v52  ;;  %v180_v17 = vld [vmem:[%s2985_s1 + $0x3e0] sm:$0xff]  ;;  %v130_v18 = vld [vmem:[%s2985_s1 + $0x250] sm:$0xff]  ;;  %v147_v19 = vld [vmem:[%s2985_s1 + $0x2d8] sm:$0xff] }
  0x1d   :  { %721 = vmatpush.msra.mxu3 %v107_v51  ;;  %702 = vmatpush.msra.mxu2 %v90_v53  ;;  %v162_v20 = vld [vmem:[%s2985_s1 + $0x350] sm:$0xff]  ;;  %v179_v21 = vld [vmem:[%s2985_s1 + $0x3d8] sm:$0xff]  ;;  %v1314_v22 = vld [vmem:[%s2984_s0 + $0x80] sm:$0xff] }
  0x1e   :  { %682 = vmatpush.msra.mxu1 %v74_v54  ;;  %663 = vmatpush.msra.mxu0 %v57_v56  ;;  %v129_v23 = vld [vmem:[%s2985_s1 + $0x248] sm:$0xff]  ;;  %v146_v24 = vld [vmem:[%s2985_s1 + $0x2d0] sm:$0xff]  ;;  %576 = vst [vmem:[#allocation1] ss:$4 sm:$0xff] %v1314_v22  ;;  %v128_v27 = vld [vmem:[%s2985_s1 + $0x240] sm:$0xff] }
  0x1f   :  { %722 = vmatpush.msra.mxu3 %v106_v55  ;;  %703 = vmatpush.msra.mxu2 %v89_v57  ;;  %v161_v25 = vld [vmem:[%s2985_s1 + $0x348] sm:$0xff]  ;;  %v178_v26 = vld [vmem:[%s2985_s1 + $0x3d0] sm:$0xff]  ;;  %v160_v29 = vld [vmem:[%s2985_s1 + $0x340] sm:$0xff] }
  0x20   :  { %683 = vmatpush.msra.mxu1 %v73_v58  ;;  %664 = vmatpush.msra.mxu0 %v56_v60  ;;  %v145_v28 = vld [vmem:[%s2985_s1 + $0x2c8] sm:$0xff]  ;;  %v127_v31 = vld [vmem:[%s2985_s1 + $0x238] sm:$0xff]  ;;  %v144_v32 = vld [vmem:[%s2985_s1 + $0x2c0] sm:$0xff] }
  0x21   :  { %723 = vmatpush.msra.mxu3 %v105_v59  ;;  %704 = vmatpush.msra.mxu2 %v88_v61  ;;  %v177_v30 = vld [vmem:[%s2985_s1 + $0x3c8] sm:$0xff]  ;;  %v159_v33 = vld [vmem:[%s2985_s1 + $0x338] sm:$0xff]  ;;  %v176_v34 = vld [vmem:[%s2985_s1 + $0x3c0] sm:$0xff] }
  0x22   :  { %729 = vmatpush.msrb.mxu0 %v135_v62  ;;  %684 = vmatpush.msra.mxu1 %v72_v0  ;;  %v126_v35 = vld [vmem:[%s2985_s1 + $0x230] sm:$0xff]  ;;  %v143_v36 = vld [vmem:[%s2985_s1 + $0x2b8] sm:$0xff]  ;;  %v1315_v39 = vld [vmem:[%s2984_s0 + $0x88] sm:$0xff] }
  0x23   :  { %769 = vmatpush.msrb.mxu2 %v167_v63  ;;  %724 = vmatpush.msra.mxu3 %v104_v1  ;;  %v158_v37 = vld [vmem:[%s2985_s1 + $0x330] sm:$0xff]  ;;  %v175_v38 = vld [vmem:[%s2985_s1 + $0x3b8] sm:$0xff]  ;;  %v125_v40 = vld [vmem:[%s2985_s1 + $0x228] sm:$0xff]  ;;  %578 = vst [vmem:[#allocation1 + $0x20] ss:$4 sm:$0xff] %v1315_v39 }
  0x24   :  { %730 = vmatpush.msrb.mxu0 %v134_v2  ;;  %749 = vmatpush.msrb.mxu1 %v151_v3  ;;  %v142_v41 = vld [vmem:[%s2985_s1 + $0x2b0] sm:$0xff]  ;;  %v157_v43 = vld [vmem:[%s2985_s1 + $0x328] sm:$0xff]  ;;  %v124_v49 = vld [vmem:[%s2985_s1 + $0x220] sm:$0xff] }
  0x25   :  { %770 = vmatpush.msrb.mxu2 %v166_v4  ;;  %789 = vmatpush.msrb.mxu3 %v183_v5  ;;  %v1316_v42 = vld [vmem:[%s2984_s0 + $0x90] sm:$0xff]  ;;  %v1695_v45 = vld.sshfl [vmem:[#allocation1] sm:$0xff pattern:$0x73625140]  ;;  %v141_v50 = vld [vmem:[%s2985_s1 + $0x2a8] sm:$0xff] }
  0x26   :  { %731 = vmatpush.msrb.mxu0 %v133_v6  ;;  %750 = vmatpush.msrb.mxu1 %v150_v7  ;;  %v581_v44 = vld.sshfl [vmem:[#allocation1 + $0x10] sm:$0xff pattern:$0x73625140]  ;;  %v1697_v46 = vld.sshfl [vmem:[#allocation1 + $0x18] sm:$0xff pattern:$0x73625140] }
  0x27   :  { %771 = vmatpush.msrb.mxu2 %v165_v8  ;;  %790 = vmatpush.msrb.mxu3 %v182_v9  ;;  %v1699_v47 = vld.sshfl [vmem:[#allocation1 + $0x8] sm:$0xff pattern:$0x73625140]  ;;  %v174_v48 = vld [vmem:[%s2985_s1 + $0x3b0] sm:$0xff]  ;;  %v156_v51 = vld [vmem:[%s2985_s1 + $0x320] sm:$0xff] }
  0x28   :  { %732 = vmatpush.msrb.mxu0 %v132_v10  ;;  %751 = vmatpush.msrb.mxu1 %v149_v11  ;;  %587 = vst [vmem:[#allocation1] ss:$4 sm:$0xff] %v1316_v42  ;;  %v173_v52 = vld [vmem:[%s2985_s1 + $0x3a8] sm:$0xff]  ;;  %v123_v53 = vld [vmem:[%s2985_s1 + $0x218] sm:$0xff]  ;;  %v140_v54 = vld [vmem:[%s2985_s1 + $0x2a0] sm:$0xff] }
  0x29   :  { %772 = vmatpush.msrb.mxu2 %v164_v12  ;;  %791 = vmatpush.msrb.mxu3 %v181_v13  ;;  %v155_v55 = vld [vmem:[%s2985_s1 + $0x318] sm:$0xff]  ;;  %v172_v56 = vld [vmem:[%s2985_s1 + $0x3a0] sm:$0xff]  ;;  %v122_v57 = vld [vmem:[%s2985_s1 + $0x210] sm:$0xff] }
  0x2a   :  { %733 = vmatpush.msrb.mxu0 %v131_v14  ;;  %752 = vmatpush.msrb.mxu1 %v148_v15  ;;  %v139_v58 = vld [vmem:[%s2985_s1 + $0x298] sm:$0xff]  ;;  %v1737_v60 = vld.sshfl [vmem:[#allocation1 + $0x30] sm:$0xff pattern:$0x73625140]  ;;  %v121_v2 = vld [vmem:[%s2985_s1 + $0x208] sm:$0xff] }
  0x2b   :  { %773 = vmatpush.msrb.mxu2 %v163_v16  ;;  %792 = vmatpush.msrb.mxu3 %v180_v17  ;;  %v1317_v59 = vld [vmem:[%s2984_s0 + $0x98] sm:$0xff]  ;;  %v1739_v61 = vld.sshfl [vmem:[#allocation1 + $0x20] sm:$0xff pattern:$0x73625140]  ;;  %v154_v0 = vld [vmem:[%s2985_s1 + $0x310] sm:$0xff] }
  0x2c   :  { %734 = vmatpush.msrb.mxu0 %v130_v18  ;;  %753 = vmatpush.msrb.mxu1 %v147_v19  ;;  %v1741_v62 = vld.sshfl [vmem:[#allocation1 + $0x38] sm:$0xff pattern:$0x73625140]  ;;  %v1743_v63 = vld.sshfl [vmem:[#allocation1 + $0x28] sm:$0xff pattern:$0x73625140] }
  0x2d   :  { %774 = vmatpush.msrb.mxu2 %v162_v20  ;;  %793 = vmatpush.msrb.mxu3 %v179_v21  ;;  %v171_v1 = vld [vmem:[%s2985_s1 + $0x398] sm:$0xff]  ;;  %588 = vst [vmem:[#allocation1 + $0x20] ss:$4 sm:$0xff] %v1317_v59  ;;  %v138_v3 = vld [vmem:[%s2985_s1 + $0x290] sm:$0xff]  ;;  %v153_v4 = vld [vmem:[%s2985_s1 + $0x308] sm:$0xff] }
  0x2e   :  { %735 = vmatpush.msrb.mxu0 %v129_v23  ;;  %754 = vmatpush.msrb.mxu1 %v146_v24  ;;  %v170_v5 = vld [vmem:[%s2985_s1 + $0x390] sm:$0xff]  ;;  %v120_v6 = vld [vmem:[%s2985_s1 + $0x200] sm:$0xff]  ;;  %v137_v7 = vld [vmem:[%s2985_s1 + $0x288] sm:$0xff] }
  0x2f   :  { %775 = vmatpush.msrb.mxu2 %v161_v25  ;;  %794 = vmatpush.msrb.mxu3 %v178_v26  ;;  %v152_v8 = vld [vmem:[%s2985_s1 + $0x300] sm:$0xff]  ;;  %v169_v9 = vld [vmem:[%s2985_s1 + $0x388] sm:$0xff]  ;;  %v199_v10 = vld [vmem:[%s2985_s1 + $0x478] sm:$0xff] }
  0x30   :  { %736 = vmatpush.msrb.mxu0 %v128_v27  ;;  %755 = vmatpush.msrb.mxu1 %v145_v28  ;;  %v231_v11 = vld [vmem:[%s2985_s1 + $0x578] sm:$0xff]  ;;  %v136_v12 = vld [vmem:[%s2985_s1 + $0x280] sm:$0xff]  ;;  %v198_v14 = vld [vmem:[%s2985_s1 + $0x470] sm:$0xff] }
  0x31   :  { %776 = vmatpush.msrb.mxu2 %v160_v29  ;;  %795 = vmatpush.msrb.mxu3 %v177_v30  ;;  %v168_v13 = vld [vmem:[%s2985_s1 + $0x380] sm:$0xff]  ;;  %v215_v15 = vld [vmem:[%s2985_s1 + $0x4f8] sm:$0xff]  ;;  %v230_v16 = vld [vmem:[%s2985_s1 + $0x570] sm:$0xff] }
  0x32   :  { %737 = vmatpush.msrb.mxu0 %v127_v31  ;;  %756 = vmatpush.msrb.mxu1 %v144_v32  ;;  %v247_v17 = vld [vmem:[%s2985_s1 + $0x5f8] sm:$0xff]  ;;  %v197_v18 = vld [vmem:[%s2985_s1 + $0x468] sm:$0xff]  ;;  %v214_v19 = vld [vmem:[%s2985_s1 + $0x4f0] sm:$0xff] }
  0x33   :  { %777 = vmatpush.msrb.mxu2 %v159_v33  ;;  %796 = vmatpush.msrb.mxu3 %v176_v34  ;;  %v229_v20 = vld [vmem:[%s2985_s1 + $0x568] sm:$0xff]  ;;  %v246_v21 = vld [vmem:[%s2985_s1 + $0x5f0] sm:$0xff]  ;;  %v196_v22 = vld [vmem:[%s2985_s1 + $0x460] sm:$0xff] }
  0x34   :  { %738 = vmatpush.msrb.mxu0 %v126_v35  ;;  %757 = vmatpush.msrb.mxu1 %v143_v36  ;;  %v213_v23 = vld [vmem:[%s2985_s1 + $0x4e8] sm:$0xff]  ;;  %v228_v24 = vld [vmem:[%s2985_s1 + $0x560] sm:$0xff]  ;;  %v1825_v26 = vld.sshfl [vmem:[#allocation1 + $0x10] sm:$0xff pattern:$0x73625140] }
  0x35   :  { %778 = vmatpush.msrb.mxu2 %v158_v37  ;;  %797 = vmatpush.msrb.mxu3 %v175_v38  ;;  %v1823_v25 = vld.sshfl [vmem:[#allocation1] sm:$0xff pattern:$0x73625140]  ;;  %v1827_v27 = vld.sshfl [vmem:[#allocation1 + $0x8] sm:$0xff pattern:$0x73625140] }
  0x36   :  { %739 = vmatpush.msrb.mxu0 %v125_v40  ;;  %758 = vmatpush.msrb.mxu1 %v142_v41  ;;  %v245_v28 = vld [vmem:[%s2985_s1 + $0x5e8] sm:$0xff]  ;;  %v1318_v29 = vld [vmem:[%s2984_s0 + $0xa0] sm:$0xff]  ;;  %v1835_v30 = vld.sshfl [vmem:[#allocation1 + $0x18] sm:$0xff pattern:$0x73625140] }
  0x37   :  { %779 = vmatpush.msrb.mxu2 %v157_v43  ;;  %798 = vmatpush.msrb.mxu3 %v174_v48  ;;  %v195_v31 = vld [vmem:[%s2985_s1 + $0x458] sm:$0xff]  ;;  %v212_v32 = vld [vmem:[%s2985_s1 + $0x4e0] sm:$0xff]  ;;  %597 = vst [vmem:[#allocation1] ss:$4 sm:$0xff] %v1318_v29 }
  0x38   :  { %740 = vmatpush.msrb.mxu0 %v124_v49  ;;  %759 = vmatpush.msrb.mxu1 %v141_v50  ;;  %v227_v33 = vld [vmem:[%s2985_s1 + $0x558] sm:$0xff] }
  0x39   :  { %780 = vmatpush.msrb.mxu2 %v156_v51  ;;  %799 = vmatpush.msrb.mxu3 %v173_v52 }
  0x3a   :  { %741 = vmatpush.msrb.mxu0 %v123_v53  ;;  %760 = vmatpush.msrb.mxu1 %v140_v54 }
  0x3b   :  { %781 = vmatpush.msrb.mxu2 %v155_v55  ;;  %800 = vmatpush.msrb.mxu3 %v172_v56 }
  0x3c   :  { %742 = vmatpush.msrb.mxu0 %v122_v57  ;;  %761 = vmatpush.msrb.mxu1 %v139_v58 }
  0x3d   :  { %782 = vmatpush.msrb.mxu2 %v154_v0  ;;  %801 = vmatpush.msrb.mxu3 %v171_v1 }
  0x3e   :  { %743 = vmatpush.msrb.mxu0 %v121_v2  ;;  %762 = vmatpush.msrb.mxu1 %v138_v3 }
  0x3f   :  { %783 = vmatpush.msrb.mxu2 %v153_v4  ;;  %802 = vmatpush.msrb.mxu3 %v170_v5 }
  0x40   :  { %705 = vmatmul.f32.vlgmr.msra.gmra.mxu2 %v581_v44  ;;  %744 = vmatpush.msrb.mxu0 %v120_v6 }
  0x41   :  { %763 = vmatpush.msrb.mxu1 %v137_v7  ;;  %784 = vmatpush.msrb.mxu2 %v152_v8 }
  0x42   :  { %803 = vmatpush.msrb.mxu3 %v169_v9  ;;  %665 = vmatmul.f32.vlgmr.msra.gmra.mxu0 %v1695_v45 }
  0x43   :  { %725 = vmatmul.f32.vlgmr.msra.gmra.mxu3 %v1697_v46  ;;  %809 = vmatpush.msra.mxu0 %v199_v10 }
  0x44   :  { %849 = vmatpush.msra.mxu2 %v231_v11  ;;  %764 = vmatpush.msrb.mxu1 %v136_v12 }
  0x45   :  { %804 = vmatpush.msrb.mxu3 %v168_v13  ;;  %685 = vmatmul.f32.vlgmr.msra.gmra.mxu1 %v1699_v47 }
  0x46   :  { %810 = vmatpush.msra.mxu0 %v198_v14  ;;  %829 = vmatpush.msra.mxu1 %v215_v15 }
  0x47   :  { %850 = vmatpush.msra.mxu2 %v230_v16  ;;  %869 = vmatpush.msra.mxu3 %v247_v17 }
  0x48   :  { %811 = vmatpush.msra.mxu0 %v197_v18  ;;  %830 = vmatpush.msra.mxu1 %v214_v19 }
  0x49   :  { %851 = vmatpush.msra.mxu2 %v229_v20  ;;  %870 = vmatpush.msra.mxu3 %v246_v21 }
  0x4a   :  { %785 = vmatmul.f32.vlgmr.msrb.gmra.mxu2 %v1737_v60  ;;  %812 = vmatpush.msra.mxu0 %v196_v22 }
  0x4b   :  { %831 = vmatpush.msra.mxu1 %v213_v23  ;;  %852 = vmatpush.msra.mxu2 %v228_v24 }
  0x4c   :  { %8 = vsyncpa [#allocation3], 0  ;;  %871 = vmatpush.msra.mxu3 %v245_v28  ;;  %745 = vmatmul.f32.vlgmr.msrb.gmra.mxu0 %v1739_v61  ;;  %v244_v34 = vld [vmem:[%s2985_s1 + $0x5e0] sm:$0xff]  ;;  %v194_v35 = vld [vmem:[%s2985_s1 + $0x450] sm:$0xff]  ;;  %vm45_vm0 = vcmask 58368  }
  0x4d   :  { %805 = vmatmul.f32.vlgmr.msrb.gmra.mxu3 %v1741_v62  ;;  %813 = vmatpush.msra.mxu0 %v195_v31  ;;  %v211_v36 = vld [vmem:[%s2985_s1 + $0x4d8] sm:$0xff]  ;;  %v226_v37 = vld [vmem:[%s2985_s1 + $0x550] sm:$0xff]  ;;  %v193_v39 = vld [vmem:[%s2985_s1 + $0x448] sm:$0xff] }
  0x4e   :  { %832 = vmatpush.msra.mxu1 %v212_v32  ;;  %853 = vmatpush.msra.mxu2 %v227_v33  ;;  %v243_v38 = vld [vmem:[%s2985_s1 + $0x5d8] sm:$0xff]  ;;  %v210_v40 = vld [vmem:[%s2985_s1 + $0x4d0] sm:$0xff]  ;;  %v225_v41 = vld [vmem:[%s2985_s1 + $0x548] sm:$0xff] }
  0x4f   :  { %872 = vmatpush.msra.mxu3 %v244_v34  ;;  %765 = vmatmul.f32.vlgmr.msrb.gmra.mxu1 %v1743_v63  ;;  %v242_v42 = vld [vmem:[%s2985_s1 + $0x5d0] sm:$0xff]  ;;  %v192_v43 = vld [vmem:[%s2985_s1 + $0x440] sm:$0xff]  ;;  %v209_v44 = vld [vmem:[%s2985_s1 + $0x4c8] sm:$0xff] }
  0x50   :  { %814 = vmatpush.msra.mxu0 %v194_v35  ;;  %833 = vmatpush.msra.mxu1 %v211_v36  ;;  %v224_v45 = vld [vmem:[%s2985_s1 + $0x540] sm:$0xff]  ;;  %v241_v46 = vld [vmem:[%s2985_s1 + $0x5c8] sm:$0xff]  ;;  %v191_v47 = vld [vmem:[%s2985_s1 + $0x438] sm:$0xff] }
  0x51   :  { %854 = vmatpush.msra.mxu2 %v226_v37  ;;  %873 = vmatpush.msra.mxu3 %v243_v38  ;;  %v208_v48 = vld [vmem:[%s2985_s1 + $0x4c0] sm:$0xff]  ;;  %v223_v49 = vld [vmem:[%s2985_s1 + $0x538] sm:$0xff]  ;;  %v190_v51 = vld [vmem:[%s2985_s1 + $0x430] sm:$0xff] }
  0x52   :  { %815 = vmatpush.msra.mxu0 %v193_v39  ;;  %834 = vmatpush.msra.mxu1 %v210_v40  ;;  %v240_v50 = vld [vmem:[%s2985_s1 + $0x5c0] sm:$0xff]  ;;  %v207_v52 = vld [vmem:[%s2985_s1 + $0x4b8] sm:$0xff]  ;;  %v222_v53 = vld [vmem:[%s2985_s1 + $0x530] sm:$0xff] }
  0x53   :  { %855 = vmatpush.msra.mxu2 %v225_v41  ;;  %874 = vmatpush.msra.mxu3 %v242_v42  ;;  %v239_v54 = vld [vmem:[%s2985_s1 + $0x5b8] sm:$0xff]  ;;  %v189_v55 = vld [vmem:[%s2985_s1 + $0x428] sm:$0xff]  ;;  %v206_v56 = vld [vmem:[%s2985_s1 + $0x4b0] sm:$0xff] }
  0x54   :  { %816 = vmatpush.msra.mxu0 %v192_v43  ;;  %835 = vmatpush.msra.mxu1 %v209_v44  ;;  %v221_v57 = vld [vmem:[%s2985_s1 + $0x528] sm:$0xff]  ;;  %v238_v58 = vld [vmem:[%s2985_s1 + $0x5b0] sm:$0xff]  ;;  %v188_v59 = vld [vmem:[%s2985_s1 + $0x420] sm:$0xff] }
  0x55   :  { %856 = vmatpush.msra.mxu2 %v224_v45  ;;  %875 = vmatpush.msra.mxu3 %v241_v46  ;;  %v205_v60 = vld [vmem:[%s2985_s1 + $0x4a8] sm:$0xff]  ;;  %v220_v61 = vld [vmem:[%s2985_s1 + $0x520] sm:$0xff]  ;;  %v187_v63 = vld [vmem:[%s2985_s1 + $0x418] sm:$0xff] }
  0x56   :  { %817 = vmatpush.msra.mxu0 %v191_v47  ;;  %836 = vmatpush.msra.mxu1 %v208_v48  ;;  %v237_v62 = vld [vmem:[%s2985_s1 + $0x5a8] sm:$0xff]  ;;  %v204_v0 = vld [vmem:[%s2985_s1 + $0x4a0] sm:$0xff]  ;;  %v219_v1 = vld [vmem:[%s2985_s1 + $0x518] sm:$0xff] }
  0x57   :  { %857 = vmatpush.msra.mxu2 %v223_v49  ;;  %876 = vmatpush.msra.mxu3 %v240_v50  ;;  %v236_v2 = vld [vmem:[%s2985_s1 + $0x5a0] sm:$0xff]  ;;  %v186_v3 = vld [vmem:[%s2985_s1 + $0x410] sm:$0xff]  ;;  %v203_v4 = vld [vmem:[%s2985_s1 + $0x498] sm:$0xff] }
  0x58   :  { %818 = vmatpush.msra.mxu0 %v190_v51  ;;  %837 = vmatpush.msra.mxu1 %v207_v52  ;;  %v218_v5 = vld [vmem:[%s2985_s1 + $0x510] sm:$0xff]  ;;  %v235_v6 = vld [vmem:[%s2985_s1 + $0x598] sm:$0xff]  ;;  %v185_v7 = vld [vmem:[%s2985_s1 + $0x408] sm:$0xff] }
  0x59   :  { %858 = vmatpush.msra.mxu2 %v222_v53  ;;  %877 = vmatpush.msra.mxu3 %v239_v54  ;;  %v202_v8 = vld [vmem:[%s2985_s1 + $0x490] sm:$0xff]  ;;  %v217_v9 = vld [vmem:[%s2985_s1 + $0x508] sm:$0xff]  ;;  %v184_v11 = vld [vmem:[%s2985_s1 + $0x400] sm:$0xff] }
  0x5a   :  { %819 = vmatpush.msra.mxu0 %v189_v55  ;;  %838 = vmatpush.msra.mxu1 %v206_v56  ;;  %v234_v10 = vld [vmem:[%s2985_s1 + $0x590] sm:$0xff]  ;;  %v201_v12 = vld [vmem:[%s2985_s1 + $0x488] sm:$0xff]  ;;  %v216_v13 = vld [vmem:[%s2985_s1 + $0x500] sm:$0xff] }
  0x5b   :  { %859 = vmatpush.msra.mxu2 %v221_v57  ;;  %878 = vmatpush.msra.mxu3 %v238_v58  ;;  %v233_v14 = vld [vmem:[%s2985_s1 + $0x588] sm:$0xff]  ;;  %v263_v15 = vld [vmem:[%s2985_s1 + $0x678] sm:$0xff]  ;;  %v200_v17 = vld [vmem:[%s2985_s1 + $0x480] sm:$0xff] }
  0x5c   :  { %820 = vmatpush.msra.mxu0 %v188_v59  ;;  %839 = vmatpush.msra.mxu1 %v205_v60  ;;  %v295_v16 = vld [vmem:[%s2985_s1 + $0x778] sm:$0xff]  ;;  %v232_v18 = vld [vmem:[%s2985_s1 + $0x580] sm:$0xff]  ;;  %v262_v19 = vld [vmem:[%s2985_s1 + $0x670] sm:$0xff] }
  0x5d   :  { %860 = vmatpush.msra.mxu2 %v220_v61  ;;  %879 = vmatpush.msra.mxu3 %v237_v62  ;;  %v279_v20 = vld [vmem:[%s2985_s1 + $0x6f8] sm:$0xff]  ;;  %v294_v21 = vld [vmem:[%s2985_s1 + $0x770] sm:$0xff]  ;;  %v261_v23 = vld [vmem:[%s2985_s1 + $0x668] sm:$0xff] }
  0x5e   :  { %821 = vmatpush.msra.mxu0 %v187_v63  ;;  %840 = vmatpush.msra.mxu1 %v204_v0  ;;  %v311_v22 = vld [vmem:[%s2985_s1 + $0x7f8] sm:$0xff]  ;;  %v278_v24 = vld [vmem:[%s2985_s1 + $0x6f0] sm:$0xff]  ;;  %v260_v28 = vld [vmem:[%s2985_s1 + $0x660] sm:$0xff] }
  0x5f   :  { %861 = vmatpush.msra.mxu2 %v219_v1  ;;  %880 = vmatpush.msra.mxu3 %v236_v2  ;;  %v2028_v29 = vld.sshfl [vmem:[#allocation1 + $0x20] sm:$0xff pattern:$0x73625140]  ;;  %v2030_v31 = vld.sshfl [vmem:[#allocation1 + $0x30] sm:$0xff pattern:$0x73625140] }
  0x60   :  { %822 = vmatpush.msra.mxu0 %v186_v3  ;;  %841 = vmatpush.msra.mxu1 %v203_v4  ;;  %v2032_v32 = vld.sshfl [vmem:[#allocation1 + $0x28] sm:$0xff pattern:$0x73625140]  ;;  %v2040_v33 = vld.sshfl [vmem:[#allocation1 + $0x38] sm:$0xff pattern:$0x73625140] }
  0x61   :  { %862 = vmatpush.msra.mxu2 %v218_v5  ;;  %881 = vmatpush.msra.mxu3 %v235_v6  ;;  %v292_v34 = vld [vmem:[%s2985_s1 + $0x760] sm:$0xff]  ;;  %v309_v35 = vld [vmem:[%s2985_s1 + $0x7e8] sm:$0xff]  ;;  %v259_v36 = vld [vmem:[%s2985_s1 + $0x658] sm:$0xff] }
  0x62   :  { %823 = vmatpush.msra.mxu0 %v185_v7  ;;  %842 = vmatpush.msra.mxu1 %v202_v8  ;;  %v276_v37 = vld [vmem:[%s2985_s1 + $0x6e0] sm:$0xff]  ;;  %v291_v38 = vld [vmem:[%s2985_s1 + $0x758] sm:$0xff]  ;;  %v258_v40 = vld [vmem:[%s2985_s1 + $0x650] sm:$0xff] }
  0x63   :  { %863 = vmatpush.msra.mxu2 %v217_v9  ;;  %882 = vmatpush.msra.mxu3 %v234_v10  ;;  %v308_v39 = vld [vmem:[%s2985_s1 + $0x7e0] sm:$0xff]  ;;  %v275_v41 = vld [vmem:[%s2985_s1 + $0x6d8] sm:$0xff]  ;;  %v290_v42 = vld [vmem:[%s2985_s1 + $0x750] sm:$0xff] }
  0x64   :  { %824 = vmatpush.msra.mxu0 %v184_v11  ;;  %843 = vmatpush.msra.mxu1 %v201_v12  ;;  %v307_v43 = vld [vmem:[%s2985_s1 + $0x7d8] sm:$0xff]  ;;  %v257_v44 = vld [vmem:[%s2985_s1 + $0x648] sm:$0xff]  ;;  %v274_v45 = vld [vmem:[%s2985_s1 + $0x6d0] sm:$0xff] }
  0x65   :  { %864 = vmatpush.msra.mxu2 %v216_v13  ;;  %883 = vmatpush.msra.mxu3 %v233_v14  ;;  %v289_v46 = vld [vmem:[%s2985_s1 + $0x748] sm:$0xff]  ;;  %v306_v47 = vld [vmem:[%s2985_s1 + $0x7d0] sm:$0xff]  ;;  %v256_v48 = vld [vmem:[%s2985_s1 + $0x640] sm:$0xff] }
  0x66   :  { %825 = vmatmul.f32.vlgmr.msra.gmra.mxu0 %v1823_v25  ;;  %865 = vmatmul.f32.vlgmr.msra.gmra.mxu2 %v1825_v26  ;;  %v293_v25 = vld [vmem:[%s2985_s1 + $0x768] sm:$0xff]  ;;  %v310_v26 = vld [vmem:[%s2985_s1 + $0x7f0] sm:$0xff]  ;;  %v288_v50 = vld [vmem:[%s2985_s1 + $0x740] sm:$0xff] }
  0x67   :  { %889 = vmatpush.msrb.mxu0 %v263_v15  ;;  %929 = vmatpush.msrb.mxu2 %v295_v16  ;;  %v273_v49 = vld [vmem:[%s2985_s1 + $0x6c8] sm:$0xff]  ;;  %v255_v52 = vld [vmem:[%s2985_s1 + $0x638] sm:$0xff]  ;;  %v272_v53 = vld [vmem:[%s2985_s1 + $0x6c0] sm:$0xff] }
  0x68   :  { %844 = vmatpush.msra.mxu1 %v200_v17  ;;  %884 = vmatpush.msra.mxu3 %v232_v18  ;;  %v305_v51 = vld [vmem:[%s2985_s1 + $0x7c8] sm:$0xff]  ;;  %v287_v54 = vld [vmem:[%s2985_s1 + $0x738] sm:$0xff]  ;;  %v304_v55 = vld [vmem:[%s2985_s1 + $0x7c0] sm:$0xff] }
  0x69   :  { %845 = vmatmul.f32.vlgmr.msra.gmra.mxu1 %v1827_v27  ;;  %885 = vmatmul.f32.vlgmr.msra.gmra.mxu3 %v1835_v30  ;;  %v277_v27 = vld [vmem:[%s2985_s1 + $0x6e8] sm:$0xff]  ;;  %v254_v56 = vld [vmem:[%s2985_s1 + $0x630] sm:$0xff]  ;;  %v271_v57 = vld [vmem:[%s2985_s1 + $0x6b8] sm:$0xff] }
  0x6a   :  { %890 = vmatpush.msrb.mxu0 %v262_v19  ;;  %909 = vmatpush.msrb.mxu1 %v279_v20  ;;  %v1319_v30 = vld [vmem:[%s2984_s0 + $0xa8] sm:$0xff]  ;;  %v286_v58 = vld [vmem:[%s2985_s1 + $0x730] sm:$0xff]  ;;  %v303_v59 = vld [vmem:[%s2985_s1 + $0x7b8] sm:$0xff] }
  0x6b   :  { %930 = vmatpush.msrb.mxu2 %v294_v21  ;;  %949 = vmatpush.msrb.mxu3 %v311_v22  ;;  %598 = vst [vmem:[#allocation1 + $0x20] ss:$4 sm:$0xff] %v1319_v30  ;;  %v253_v60 = vld [vmem:[%s2985_s1 + $0x628] sm:$0xff]  ;;  %v270_v61 = vld [vmem:[%s2985_s1 + $0x6b0] sm:$0xff]  ;;  %v252_v0 = vld [vmem:[%s2985_s1 + $0x620] sm:$0xff] }
  0x6c   :  { %891 = vmatpush.msrb.mxu0 %v261_v23  ;;  %910 = vmatpush.msrb.mxu1 %v278_v24  ;;  %v285_v62 = vld [vmem:[%s2985_s1 + $0x728] sm:$0xff]  ;;  %v302_v63 = vld [vmem:[%s2985_s1 + $0x7b0] sm:$0xff]  ;;  %v284_v2 = vld [vmem:[%s2985_s1 + $0x720] sm:$0xff] }
  0x6d   :  { %931 = vmatpush.msrb.mxu2 %v293_v25  ;;  %950 = vmatpush.msrb.mxu3 %v310_v26  ;;  %v269_v1 = vld [vmem:[%s2985_s1 + $0x6a8] sm:$0xff]  ;;  %v251_v4 = vld [vmem:[%s2985_s1 + $0x618] sm:$0xff]  ;;  %v268_v5 = vld [vmem:[%s2985_s1 + $0x6a0] sm:$0xff] }
  0x6e   :  { %892 = vmatpush.msrb.mxu0 %v260_v28  ;;  %911 = vmatpush.msrb.mxu1 %v277_v27  ;;  %v301_v3 = vld [vmem:[%s2985_s1 + $0x7a8] sm:$0xff]  ;;  %v283_v6 = vld [vmem:[%s2985_s1 + $0x718] sm:$0xff]  ;;  %v300_v7 = vld [vmem:[%s2985_s1 + $0x7a0] sm:$0xff] }
  0x6f   :  { %932 = vmatpush.msrb.mxu2 %v292_v34  ;;  %951 = vmatpush.msrb.mxu3 %v309_v35  ;;  %v250_v8 = vld [vmem:[%s2985_s1 + $0x610] sm:$0xff]  ;;  %v267_v9 = vld [vmem:[%s2985_s1 + $0x698] sm:$0xff]  ;;  %v249_v12 = vld [vmem:[%s2985_s1 + $0x608] sm:$0xff] }
  0x70   :  { %893 = vmatpush.msrb.mxu0 %v259_v36  ;;  %912 = vmatpush.msrb.mxu1 %v276_v37  ;;  %v282_v10 = vld [vmem:[%s2985_s1 + $0x710] sm:$0xff]  ;;  %v299_v11 = vld [vmem:[%s2985_s1 + $0x798] sm:$0xff]  ;;  %v281_v14 = vld [vmem:[%s2985_s1 + $0x708] sm:$0xff] }
  0x71   :  { %933 = vmatpush.msrb.mxu2 %v291_v38  ;;  %952 = vmatpush.msrb.mxu3 %v308_v39  ;;  %v266_v13 = vld [vmem:[%s2985_s1 + $0x690] sm:$0xff]  ;;  %v248_v16 = vld [vmem:[%s2985_s1 + $0x600] sm:$0xff]  ;;  %v265_v17 = vld [vmem:[%s2985_s1 + $0x688] sm:$0xff] }
  0x72   :  { %894 = vmatpush.msrb.mxu0 %v258_v40  ;;  %913 = vmatpush.msrb.mxu1 %v275_v41  ;;  %v298_v15 = vld [vmem:[%s2985_s1 + $0x790] sm:$0xff]  ;;  %v280_v18 = vld [vmem:[%s2985_s1 + $0x700] sm:$0xff]  ;;  %v297_v19 = vld [vmem:[%s2985_s1 + $0x788] sm:$0xff] }
  0x73   :  { %934 = vmatpush.msrb.mxu2 %v290_v42  ;;  %953 = vmatpush.msrb.mxu3 %v307_v43  ;;  %v327_v20 = vld [vmem:[%s2985_s1 + $0x878] sm:$0xff]  ;;  %v264_v22 = vld [vmem:[%s2985_s1 + $0x680] sm:$0xff]  ;;  %v326_v24 = vld [vmem:[%s2985_s1 + $0x870] sm:$0xff] }
  0x74   :  { %895 = vmatpush.msrb.mxu0 %v257_v44  ;;  %914 = vmatpush.msrb.mxu1 %v274_v45  ;;  %v359_v21 = vld [vmem:[%s2985_s1 + $0x978] sm:$0xff]  ;;  %v296_v23 = vld [vmem:[%s2985_s1 + $0x780] sm:$0xff]  ;;  %v358_v26 = vld [vmem:[%s2985_s1 + $0x970] sm:$0xff] }
  0x75   :  { %935 = vmatpush.msrb.mxu2 %v289_v46  ;;  %954 = vmatpush.msrb.mxu3 %v306_v47  ;;  %v343_v25 = vld [vmem:[%s2985_s1 + $0x8f8] sm:$0xff]  ;;  %v357_v27 = vld [vmem:[%s2985_s1 + $0x968] sm:$0xff]  ;;  %v324_v30 = vld [vmem:[%s2985_s1 + $0x860] sm:$0xff] }
  0x76   :  { %896 = vmatpush.msrb.mxu0 %v256_v48  ;;  %915 = vmatpush.msrb.mxu1 %v273_v49  ;;  %v375_v28 = vld [vmem:[%s2985_s1 + $0x9f8] sm:$0xff]  ;;  %v356_v34 = vld [vmem:[%s2985_s1 + $0x960] sm:$0xff]  ;;  %v373_v35 = vld [vmem:[%s2985_s1 + $0x9e8] sm:$0xff] }
  0x77   :  { %936 = vmatpush.msrb.mxu2 %v288_v50  ;;  %955 = vmatpush.msrb.mxu3 %v305_v51  ;;  %v323_v36 = vld [vmem:[%s2985_s1 + $0x858] sm:$0xff]  ;;  %v340_v37 = vld [vmem:[%s2985_s1 + $0x8e0] sm:$0xff]  ;;  %v322_v40 = vld [vmem:[%s2985_s1 + $0x850] sm:$0xff] }
  0x78   :  { %897 = vmatpush.msrb.mxu0 %v255_v52  ;;  %916 = vmatpush.msrb.mxu1 %v272_v53  ;;  %v355_v38 = vld [vmem:[%s2985_s1 + $0x958] sm:$0xff]  ;;  %v372_v39 = vld [vmem:[%s2985_s1 + $0x9e0] sm:$0xff]  ;;  %v354_v42 = vld [vmem:[%s2985_s1 + $0x950] sm:$0xff] }
  0x79   :  { %937 = vmatpush.msrb.mxu2 %v287_v54  ;;  %956 = vmatpush.msrb.mxu3 %v304_v55  ;;  %v339_v41 = vld [vmem:[%s2985_s1 + $0x8d8] sm:$0xff]  ;;  %v321_v44 = vld [vmem:[%s2985_s1 + $0x848] sm:$0xff]  ;;  %v338_v45 = vld [vmem:[%s2985_s1 + $0x8d0] sm:$0xff] }
  0x7a   :  { %898 = vmatpush.msrb.mxu0 %v254_v56  ;;  %917 = vmatpush.msrb.mxu1 %v271_v57  ;;  %v371_v43 = vld [vmem:[%s2985_s1 + $0x9d8] sm:$0xff]  ;;  %v353_v46 = vld [vmem:[%s2985_s1 + $0x948] sm:$0xff]  ;;  %v370_v47 = vld [vmem:[%s2985_s1 + $0x9d0] sm:$0xff] }
  0x7b   :  { %938 = vmatpush.msrb.mxu2 %v286_v58  ;;  %957 = vmatpush.msrb.mxu3 %v303_v59  ;;  %v320_v48 = vld [vmem:[%s2985_s1 + $0x840] sm:$0xff]  ;;  %v337_v49 = vld [vmem:[%s2985_s1 + $0x8c8] sm:$0xff]  ;;  %v319_v52 = vld [vmem:[%s2985_s1 + $0x838] sm:$0xff] }
  0x7c   :  { %899 = vmatpush.msrb.mxu0 %v253_v60  ;;  %918 = vmatpush.msrb.mxu1 %v270_v61  ;;  %v352_v50 = vld [vmem:[%s2985_s1 + $0x940] sm:$0xff]  ;;  %v369_v51 = vld [vmem:[%s2985_s1 + $0x9c8] sm:$0xff]  ;;  %v351_v54 = vld [vmem:[%s2985_s1 + $0x938] sm:$0xff] }
  0x7d   :  { %939 = vmatpush.msrb.mxu2 %v285_v62  ;;  %958 = vmatpush.msrb.mxu3 %v302_v63  ;;  %v336_v53 = vld [vmem:[%s2985_s1 + $0x8c0] sm:$0xff]  ;;  %v318_v56 = vld [vmem:[%s2985_s1 + $0x830] sm:$0xff]  ;;  %v335_v57 = vld [vmem:[%s2985_s1 + $0x8b8] sm:$0xff] }
  0x7e   :  { %900 = vmatpush.msrb.mxu0 %v252_v0  ;;  %919 = vmatpush.msrb.mxu1 %v269_v1  ;;  %v368_v55 = vld [vmem:[%s2985_s1 + $0x9c0] sm:$0xff]  ;;  %v350_v58 = vld [vmem:[%s2985_s1 + $0x930] sm:$0xff]  ;;  %v367_v59 = vld [vmem:[%s2985_s1 + $0x9b8] sm:$0xff] }
  0x7f   :  { %940 = vmatpush.msrb.mxu2 %v284_v2  ;;  %959 = vmatpush.msrb.mxu3 %v301_v3  ;;  %v317_v60 = vld [vmem:[%s2985_s1 + $0x828] sm:$0xff]  ;;  %v334_v61 = vld [vmem:[%s2985_s1 + $0x8b0] sm:$0xff]  ;;  %v316_v0 = vld [vmem:[%s2985_s1 + $0x820] sm:$0xff] }
  0x80   :  { %901 = vmatpush.msrb.mxu0 %v251_v4  ;;  %920 = vmatpush.msrb.mxu1 %v268_v5  ;;  %v349_v62 = vld [vmem:[%s2985_s1 + $0x928] sm:$0xff]  ;;  %v366_v63 = vld [vmem:[%s2985_s1 + $0x9b0] sm:$0xff]  ;;  %v348_v2 = vld [vmem:[%s2985_s1 + $0x920] sm:$0xff] }
  0x81   :  { %941 = vmatpush.msrb.mxu2 %v283_v6  ;;  %960 = vmatpush.msrb.mxu3 %v300_v7  ;;  %v333_v1 = vld [vmem:[%s2985_s1 + $0x8a8] sm:$0xff]  ;;  %v315_v4 = vld [vmem:[%s2985_s1 + $0x818] sm:$0xff]  ;;  %v332_v5 = vld [vmem:[%s2985_s1 + $0x8a0] sm:$0xff] }
  0x82   :  { %902 = vmatpush.msrb.mxu0 %v250_v8  ;;  %921 = vmatpush.msrb.mxu1 %v267_v9  ;;  %v365_v3 = vld [vmem:[%s2985_s1 + $0x9a8] sm:$0xff]  ;;  %v347_v6 = vld [vmem:[%s2985_s1 + $0x918] sm:$0xff]  ;;  %v364_v7 = vld [vmem:[%s2985_s1 + $0x9a0] sm:$0xff] }
  0x83   :  { %942 = vmatpush.msrb.mxu2 %v282_v10  ;;  %961 = vmatpush.msrb.mxu3 %v299_v11  ;;  %v314_v8 = vld [vmem:[%s2985_s1 + $0x810] sm:$0xff]  ;;  %v331_v9 = vld [vmem:[%s2985_s1 + $0x898] sm:$0xff] }
  0x84   :  { %903 = vmatpush.msrb.mxu0 %v249_v12  ;;  %922 = vmatpush.msrb.mxu1 %v266_v13  ;;  %v346_v10 = vld [vmem:[%s2985_s1 + $0x910] sm:$0xff]  ;;  %v363_v11 = vld [vmem:[%s2985_s1 + $0x998] sm:$0xff]  ;;  %v313_v12 = vld [vmem:[%s2985_s1 + $0x808] sm:$0xff] }
  0x85   :  { %943 = vmatpush.msrb.mxu2 %v281_v14  ;;  %962 = vmatpush.msrb.mxu3 %v298_v15  ;;  %v330_v13 = vld [vmem:[%s2985_s1 + $0x890] sm:$0xff]  ;;  %v345_v14 = vld [vmem:[%s2985_s1 + $0x908] sm:$0xff] }
  0x86   :  { %904 = vmatpush.msrb.mxu0 %v248_v16  ;;  %923 = vmatpush.msrb.mxu1 %v265_v17  ;;  %v362_v15 = vld [vmem:[%s2985_s1 + $0x990] sm:$0xff]  ;;  %v312_v16 = vld [vmem:[%s2985_s1 + $0x800] sm:$0xff]  ;;  %v329_v17 = vld [vmem:[%s2985_s1 + $0x888] sm:$0xff] }
  0x87   :  { %944 = vmatpush.msrb.mxu2 %v280_v18  ;;  %963 = vmatpush.msrb.mxu3 %v297_v19  ;;  %v344_v18 = vld [vmem:[%s2985_s1 + $0x900] sm:$0xff]  ;;  %v361_v19 = vld [vmem:[%s2985_s1 + $0x988] sm:$0xff] }
  0x88   :  { %905 = vmatmul.f32.vlgmr.msrb.gmra.mxu0 %v2028_v29  ;;  %945 = vmatmul.f32.vlgmr.msrb.gmra.mxu2 %v2030_v31  ;;  %v325_v29 = vld [vmem:[%s2985_s1 + $0x868] sm:$0xff]  ;;  %v342_v31 = vld [vmem:[%s2985_s1 + $0x8f0] sm:$0xff] }
  0x89   :  { %969 = vmatpush.msra.mxu0 %v327_v20  ;;  %1009 = vmatpush.msra.mxu2 %v359_v21  ;;  %v599_v20 = vld.sshfl [vmem:[#allocation1] sm:$0xff pattern:$0x73625140]  ;;  %v601_v21 = vld.sshfl [vmem:[#allocation1 + $0x10] sm:$0xff pattern:$0x73625140] }
  0x8a   :  { %924 = vmatpush.msrb.mxu1 %v264_v22  ;;  %964 = vmatpush.msrb.mxu3 %v296_v23  ;;  %v391_v22 = vld [vmem:[%s2985_s1 + $0xa78] sm:$0xff] }
  0x8b   :  { %925 = vmatmul.f32.vlgmr.msrb.gmra.mxu1 %v2032_v32  ;;  %965 = vmatmul.f32.vlgmr.msrb.gmra.mxu3 %v2040_v33  ;;  %v374_v32 = vld [vmem:[%s2985_s1 + $0x9f0] sm:$0xff]  ;;  %v341_v33 = vld [vmem:[%s2985_s1 + $0x8e8] sm:$0xff]  ;;  %v423_v23 = vld [vmem:[%s2985_s1 + $0xb78] sm:$0xff] }
  0x8c   :  { %970 = vmatpush.msra.mxu0 %v326_v24  ;;  %989 = vmatpush.msra.mxu1 %v343_v25  ;;  %v328_v24 = vld [vmem:[%s2985_s1 + $0x880] sm:$0xff] }
  0x8d   :  { %1010 = vmatpush.msra.mxu2 %v358_v26  ;;  %1029 = vmatpush.msra.mxu3 %v375_v28  ;;  %v360_v25 = vld [vmem:[%s2985_s1 + $0x980] sm:$0xff]  ;;  %v600_v26 = vld.sshfl [vmem:[#allocation1 + $0x8] sm:$0xff pattern:$0x73625140] }
  0x8e   :  { %971 = vmatpush.msra.mxu0 %v325_v29  ;;  %990 = vmatpush.msra.mxu1 %v342_v31  ;;  %v602_v28 = vld.sshfl [vmem:[#allocation1 + $0x18] sm:$0xff pattern:$0x73625140]  ;;  %v390_v29 = vld [vmem:[%s2985_s1 + $0xa70] sm:$0xff] }
  0x8f   :  { %1011 = vmatpush.msra.mxu2 %v357_v27  ;;  %1030 = vmatpush.msra.mxu3 %v374_v32  ;;  %v407_v31 = vld [vmem:[%s2985_s1 + $0xaf8] sm:$0xff]  ;;  %v422_v27 = vld [vmem:[%s2985_s1 + $0xb70] sm:$0xff] }
  0x90   :  { %972 = vmatpush.msra.mxu0 %v324_v30  ;;  %991 = vmatpush.msra.mxu1 %v341_v33  ;;  %v439_v32 = vld [vmem:[%s2985_s1 + $0xbf8] sm:$0xff]  ;;  %v389_v30 = vld [vmem:[%s2985_s1 + $0xa68] sm:$0xff]  ;;  %v406_v33 = vld [vmem:[%s2985_s1 + $0xaf0] sm:$0xff] }
  0x91   :  { %1012 = vmatpush.msra.mxu2 %v356_v34  ;;  %1031 = vmatpush.msra.mxu3 %v373_v35  ;;  %v421_v34 = vld [vmem:[%s2985_s1 + $0xb68] sm:$0xff]  ;;  %v438_v35 = vld [vmem:[%s2985_s1 + $0xbf0] sm:$0xff] }
  0x92   :  { %973 = vmatpush.msra.mxu0 %v323_v36  ;;  %992 = vmatpush.msra.mxu1 %v340_v37  ;;  %v388_v36 = vld [vmem:[%s2985_s1 + $0xa60] sm:$0xff]  ;;  %v405_v37 = vld [vmem:[%s2985_s1 + $0xae8] sm:$0xff] }
  0x93   :  { %1013 = vmatpush.msra.mxu2 %v355_v38  ;;  %1032 = vmatpush.msra.mxu3 %v372_v39  ;;  %v420_v38 = vld [vmem:[%s2985_s1 + $0xb60] sm:$0xff]  ;;  %v437_v39 = vld [vmem:[%s2985_s1 + $0xbe8] sm:$0xff] }
  0x94   :  { %974 = vmatpush.msra.mxu0 %v322_v40  ;;  %993 = vmatpush.msra.mxu1 %v339_v41  ;;  %v387_v40 = vld [vmem:[%s2985_s1 + $0xa58] sm:$0xff]  ;;  %v404_v41 = vld [vmem:[%s2985_s1 + $0xae0] sm:$0xff] }
  0x95   :  { %1014 = vmatpush.msra.mxu2 %v354_v42  ;;  %1033 = vmatpush.msra.mxu3 %v371_v43  ;;  %v419_v42 = vld [vmem:[%s2985_s1 + $0xb58] sm:$0xff]  ;;  %v436_v43 = vld [vmem:[%s2985_s1 + $0xbe0] sm:$0xff] }
  0x96   :  { %975 = vmatpush.msra.mxu0 %v321_v44  ;;  %994 = vmatpush.msra.mxu1 %v338_v45  ;;  %v386_v44 = vld [vmem:[%s2985_s1 + $0xa50] sm:$0xff]  ;;  %v403_v45 = vld [vmem:[%s2985_s1 + $0xad8] sm:$0xff] }
  0x97   :  { %1015 = vmatpush.msra.mxu2 %v353_v46  ;;  %1034 = vmatpush.msra.mxu3 %v370_v47  ;;  %v418_v46 = vld [vmem:[%s2985_s1 + $0xb50] sm:$0xff]  ;;  %v435_v47 = vld [vmem:[%s2985_s1 + $0xbd8] sm:$0xff] }
  0x98   :  { %976 = vmatpush.msra.mxu0 %v320_v48  ;;  %995 = vmatpush.msra.mxu1 %v337_v49  ;;  %v385_v48 = vld [vmem:[%s2985_s1 + $0xa48] sm:$0xff]  ;;  %v402_v49 = vld [vmem:[%s2985_s1 + $0xad0] sm:$0xff] }
  0x99   :  { %1016 = vmatpush.msra.mxu2 %v352_v50  ;;  %1035 = vmatpush.msra.mxu3 %v369_v51  ;;  %v417_v50 = vld [vmem:[%s2985_s1 + $0xb48] sm:$0xff]  ;;  %v434_v51 = vld [vmem:[%s2985_s1 + $0xbd0] sm:$0xff] }
  0x9a   :  { %977 = vmatpush.msra.mxu0 %v319_v52  ;;  %996 = vmatpush.msra.mxu1 %v336_v53  ;;  %v384_v52 = vld [vmem:[%s2985_s1 + $0xa40] sm:$0xff]  ;;  %v401_v53 = vld [vmem:[%s2985_s1 + $0xac8] sm:$0xff] }
  0x9b   :  { %1017 = vmatpush.msra.mxu2 %v351_v54  ;;  %1036 = vmatpush.msra.mxu3 %v368_v55  ;;  %v416_v54 = vld [vmem:[%s2985_s1 + $0xb40] sm:$0xff]  ;;  %v433_v55 = vld [vmem:[%s2985_s1 + $0xbc8] sm:$0xff] }
  0x9c   :  { %978 = vmatpush.msra.mxu0 %v318_v56  ;;  %997 = vmatpush.msra.mxu1 %v335_v57  ;;  %v383_v56 = vld [vmem:[%s2985_s1 + $0xa38] sm:$0xff]  ;;  %v400_v57 = vld [vmem:[%s2985_s1 + $0xac0] sm:$0xff] }
  0x9d   :  { %1018 = vmatpush.msra.mxu2 %v350_v58  ;;  %1037 = vmatpush.msra.mxu3 %v367_v59  ;;  %v415_v58 = vld [vmem:[%s2985_s1 + $0xb38] sm:$0xff]  ;;  %v432_v59 = vld [vmem:[%s2985_s1 + $0xbc0] sm:$0xff] }
  0x9e   :  { %979 = vmatpush.msra.mxu0 %v317_v60  ;;  %998 = vmatpush.msra.mxu1 %v334_v61  ;;  %v382_v60 = vld [vmem:[%s2985_s1 + $0xa30] sm:$0xff]  ;;  %v399_v61 = vld [vmem:[%s2985_s1 + $0xab8] sm:$0xff] }
  0x9f   :  { %1019 = vmatpush.msra.mxu2 %v349_v62  ;;  %1038 = vmatpush.msra.mxu3 %v366_v63  ;;  %v414_v62 = vld [vmem:[%s2985_s1 + $0xb30] sm:$0xff]  ;;  %v431_v63 = vld [vmem:[%s2985_s1 + $0xbb8] sm:$0xff] }
  0xa0   :  { %980 = vmatpush.msra.mxu0 %v316_v0  ;;  %999 = vmatpush.msra.mxu1 %v333_v1  ;;  %v381_v0 = vld [vmem:[%s2985_s1 + $0xa28] sm:$0xff]  ;;  %v398_v1 = vld [vmem:[%s2985_s1 + $0xab0] sm:$0xff] }
  0xa1   :  { %1020 = vmatpush.msra.mxu2 %v348_v2  ;;  %1039 = vmatpush.msra.mxu3 %v365_v3  ;;  %v413_v2 = vld [vmem:[%s2985_s1 + $0xb28] sm:$0xff]  ;;  %v430_v3 = vld [vmem:[%s2985_s1 + $0xbb0] sm:$0xff] }
  0xa2   :  { %981 = vmatpush.msra.mxu0 %v315_v4  ;;  %1000 = vmatpush.msra.mxu1 %v332_v5  ;;  %v380_v4 = vld [vmem:[%s2985_s1 + $0xa20] sm:$0xff]  ;;  %v397_v5 = vld [vmem:[%s2985_s1 + $0xaa8] sm:$0xff] }
  0xa3   :  { %1021 = vmatpush.msra.mxu2 %v347_v6  ;;  %1040 = vmatpush.msra.mxu3 %v364_v7  ;;  %v412_v6 = vld [vmem:[%s2985_s1 + $0xb20] sm:$0xff]  ;;  %v429_v7 = vld [vmem:[%s2985_s1 + $0xba8] sm:$0xff] }
  0xa4   :  { %982 = vmatpush.msra.mxu0 %v314_v8  ;;  %1001 = vmatpush.msra.mxu1 %v331_v9  ;;  %v379_v8 = vld [vmem:[%s2985_s1 + $0xa18] sm:$0xff]  ;;  %v396_v9 = vld [vmem:[%s2985_s1 + $0xaa0] sm:$0xff] }
  0xa5   :  { %1022 = vmatpush.msra.mxu2 %v346_v10  ;;  %1041 = vmatpush.msra.mxu3 %v363_v11  ;;  %v411_v10 = vld [vmem:[%s2985_s1 + $0xb18] sm:$0xff]  ;;  %v428_v11 = vld [vmem:[%s2985_s1 + $0xba0] sm:$0xff] }
  0xa6   :  { %983 = vmatpush.msra.mxu0 %v313_v12  ;;  %1002 = vmatpush.msra.mxu1 %v330_v13  ;;  %v378_v12 = vld [vmem:[%s2985_s1 + $0xa10] sm:$0xff]  ;;  %v395_v13 = vld [vmem:[%s2985_s1 + $0xa98] sm:$0xff] }
  0xa7   :  { %1023 = vmatpush.msra.mxu2 %v345_v14  ;;  %1042 = vmatpush.msra.mxu3 %v362_v15  ;;  %v410_v14 = vld [vmem:[%s2985_s1 + $0xb10] sm:$0xff]  ;;  %v427_v15 = vld [vmem:[%s2985_s1 + $0xb98] sm:$0xff] }
  0xa8   :  { %984 = vmatpush.msra.mxu0 %v312_v16  ;;  %1003 = vmatpush.msra.mxu1 %v329_v17  ;;  %v377_v16 = vld [vmem:[%s2985_s1 + $0xa08] sm:$0xff]  ;;  %v394_v17 = vld [vmem:[%s2985_s1 + $0xa90] sm:$0xff] }
  0xa9   :  { %1024 = vmatpush.msra.mxu2 %v344_v18  ;;  %1043 = vmatpush.msra.mxu3 %v361_v19  ;;  %v1320_v18 = vld [vmem:[%s2984_s0 + $0xb0] sm:$0xff]  ;;  %v409_v19 = vld [vmem:[%s2985_s1 + $0xb08] sm:$0xff] }
  0xaa   :  { %985 = vmatmul.f32.vlgmr.msra.gmra.mxu0 %v599_v20  ;;  %1025 = vmatmul.f32.vlgmr.msra.gmra.mxu2 %v601_v21  ;;  %v426_v20 = vld [vmem:[%s2985_s1 + $0xb90] sm:$0xff]  ;;  %607 = vst [vmem:[#allocation1] ss:$4 sm:$0xff] %v1320_v18  ;;  %v376_v21 = vld [vmem:[%s2985_s1 + $0xa00] sm:$0xff]  ;;  %v459_v18 = vld [vmem:[%s2985_s1 + $0xc98] sm:$0xff] }
  0xab   :  { %1049 = vmatpush.msrb.mxu0 %v391_v22  ;;  %1089 = vmatpush.msrb.mxu2 %v423_v23  ;;  %v393_v22 = vld [vmem:[%s2985_s1 + $0xa88] sm:$0xff]  ;;  %v408_v23 = vld [vmem:[%s2985_s1 + $0xb00] sm:$0xff] }
  0xac   :  { %1004 = vmatpush.msra.mxu1 %v328_v24  ;;  %1044 = vmatpush.msra.mxu3 %v360_v25  ;;  %v425_v24 = vld [vmem:[%s2985_s1 + $0xb88] sm:$0xff]  ;;  %v603_v25 = vld.sshfl [vmem:[#allocation1 + $0x20] sm:$0xff pattern:$0x73625140] }
  0xad   :  { %1005 = vmatmul.f32.vlgmr.msra.gmra.mxu1 %v600_v26  ;;  %1045 = vmatmul.f32.vlgmr.msra.gmra.mxu3 %v602_v28  ;;  %v605_v26 = vld.sshfl [vmem:[#allocation1 + $0x30] sm:$0xff pattern:$0x73625140]  ;;  %v455_v28 = vld [vmem:[%s2985_s1 + $0xc78] sm:$0xff] }
  0xae   :  { %1050 = vmatpush.msrb.mxu0 %v390_v29  ;;  %1069 = vmatpush.msrb.mxu1 %v407_v31  ;;  %v487_v29 = vld [vmem:[%s2985_s1 + $0xd78] sm:$0xff]  ;;  %v392_v31 = vld [vmem:[%s2985_s1 + $0xa80] sm:$0xff] }
  0xaf   :  { %1090 = vmatpush.msrb.mxu2 %v422_v27  ;;  %1109 = vmatpush.msrb.mxu3 %v439_v32  ;;  %v424_v27 = vld [vmem:[%s2985_s1 + $0xb80] sm:$0xff]  ;;  %v604_v32 = vld.sshfl [vmem:[#allocation1 + $0x28] sm:$0xff pattern:$0x73625140] }
  0xb0   :  { %1051 = vmatpush.msrb.mxu0 %v389_v30  ;;  %1070 = vmatpush.msrb.mxu1 %v406_v33  ;;  %v606_v30 = vld.sshfl [vmem:[#allocation1 + $0x38] sm:$0xff pattern:$0x73625140]  ;;  %v454_v33 = vld [vmem:[%s2985_s1 + $0xc70] sm:$0xff] }
  0xb1   :  { %1091 = vmatpush.msrb.mxu2 %v421_v34  ;;  %1110 = vmatpush.msrb.mxu3 %v438_v35  ;;  %v471_v34 = vld [vmem:[%s2985_s1 + $0xcf8] sm:$0xff]  ;;  %v486_v35 = vld [vmem:[%s2985_s1 + $0xd70] sm:$0xff] }
  0xb2   :  { %1052 = vmatpush.msrb.mxu0 %v388_v36  ;;  %1071 = vmatpush.msrb.mxu1 %v405_v37  ;;  %v503_v36 = vld [vmem:[%s2985_s1 + $0xdf8] sm:$0xff]  ;;  %v453_v37 = vld [vmem:[%s2985_s1 + $0xc68] sm:$0xff] }
  0xb3   :  { %1092 = vmatpush.msrb.mxu2 %v420_v38  ;;  %1111 = vmatpush.msrb.mxu3 %v437_v39  ;;  %v470_v38 = vld [vmem:[%s2985_s1 + $0xcf0] sm:$0xff]  ;;  %v485_v39 = vld [vmem:[%s2985_s1 + $0xd68] sm:$0xff] }
  0xb4   :  { %1053 = vmatpush.msrb.mxu0 %v387_v40  ;;  %1072 = vmatpush.msrb.mxu1 %v404_v41  ;;  %v502_v40 = vld [vmem:[%s2985_s1 + $0xdf0] sm:$0xff]  ;;  %v452_v41 = vld [vmem:[%s2985_s1 + $0xc60] sm:$0xff] }
  0xb5   :  { %1093 = vmatpush.msrb.mxu2 %v419_v42  ;;  %1112 = vmatpush.msrb.mxu3 %v436_v43  ;;  %v469_v42 = vld [vmem:[%s2985_s1 + $0xce8] sm:$0xff]  ;;  %v484_v43 = vld [vmem:[%s2985_s1 + $0xd60] sm:$0xff] }
  0xb6   :  { %1054 = vmatpush.msrb.mxu0 %v386_v44  ;;  %1073 = vmatpush.msrb.mxu1 %v403_v45  ;;  %v501_v44 = vld [vmem:[%s2985_s1 + $0xde8] sm:$0xff]  ;;  %v451_v45 = vld [vmem:[%s2985_s1 + $0xc58] sm:$0xff] }
  0xb7   :  { %1094 = vmatpush.msrb.mxu2 %v418_v46  ;;  %1113 = vmatpush.msrb.mxu3 %v435_v47  ;;  %v468_v46 = vld [vmem:[%s2985_s1 + $0xce0] sm:$0xff]  ;;  %v483_v47 = vld [vmem:[%s2985_s1 + $0xd58] sm:$0xff] }
  0xb8   :  { %1055 = vmatpush.msrb.mxu0 %v385_v48  ;;  %1074 = vmatpush.msrb.mxu1 %v402_v49  ;;  %v500_v48 = vld [vmem:[%s2985_s1 + $0xde0] sm:$0xff]  ;;  %v450_v49 = vld [vmem:[%s2985_s1 + $0xc50] sm:$0xff] }
  0xb9   :  { %1095 = vmatpush.msrb.mxu2 %v417_v50  ;;  %1114 = vmatpush.msrb.mxu3 %v434_v51  ;;  %v467_v50 = vld [vmem:[%s2985_s1 + $0xcd8] sm:$0xff]  ;;  %v482_v51 = vld [vmem:[%s2985_s1 + $0xd50] sm:$0xff] }
  0xba   :  { %1056 = vmatpush.msrb.mxu0 %v384_v52  ;;  %1075 = vmatpush.msrb.mxu1 %v401_v53  ;;  %v499_v52 = vld [vmem:[%s2985_s1 + $0xdd8] sm:$0xff]  ;;  %v449_v53 = vld [vmem:[%s2985_s1 + $0xc48] sm:$0xff] }
  0xbb   :  { %1096 = vmatpush.msrb.mxu2 %v416_v54  ;;  %1115 = vmatpush.msrb.mxu3 %v433_v55  ;;  %v466_v54 = vld [vmem:[%s2985_s1 + $0xcd0] sm:$0xff]  ;;  %v481_v55 = vld [vmem:[%s2985_s1 + $0xd48] sm:$0xff] }
  0xbc   :  { %1057 = vmatpush.msrb.mxu0 %v383_v56  ;;  %1076 = vmatpush.msrb.mxu1 %v400_v57  ;;  %v498_v56 = vld [vmem:[%s2985_s1 + $0xdd0] sm:$0xff]  ;;  %v448_v57 = vld [vmem:[%s2985_s1 + $0xc40] sm:$0xff] }
  0xbd   :  { %1097 = vmatpush.msrb.mxu2 %v415_v58  ;;  %1116 = vmatpush.msrb.mxu3 %v432_v59  ;;  %v465_v58 = vld [vmem:[%s2985_s1 + $0xcc8] sm:$0xff]  ;;  %v480_v59 = vld [vmem:[%s2985_s1 + $0xd40] sm:$0xff] }
  0xbe   :  { %1058 = vmatpush.msrb.mxu0 %v382_v60  ;;  %1077 = vmatpush.msrb.mxu1 %v399_v61  ;;  %v497_v60 = vld [vmem:[%s2985_s1 + $0xdc8] sm:$0xff]  ;;  %v447_v61 = vld [vmem:[%s2985_s1 + $0xc38] sm:$0xff] }
  0xbf   :  { %1098 = vmatpush.msrb.mxu2 %v414_v62  ;;  %1117 = vmatpush.msrb.mxu3 %v431_v63  ;;  %v464_v62 = vld [vmem:[%s2985_s1 + $0xcc0] sm:$0xff]  ;;  %v479_v63 = vld [vmem:[%s2985_s1 + $0xd38] sm:$0xff] }
  0xc0   :  { %1059 = vmatpush.msrb.mxu0 %v381_v0  ;;  %1078 = vmatpush.msrb.mxu1 %v398_v1  ;;  %v496_v0 = vld [vmem:[%s2985_s1 + $0xdc0] sm:$0xff]  ;;  %v446_v1 = vld [vmem:[%s2985_s1 + $0xc30] sm:$0xff] }
  0xc1   :  { %1099 = vmatpush.msrb.mxu2 %v413_v2  ;;  %1118 = vmatpush.msrb.mxu3 %v430_v3  ;;  %v463_v2 = vld [vmem:[%s2985_s1 + $0xcb8] sm:$0xff]  ;;  %v478_v3 = vld [vmem:[%s2985_s1 + $0xd30] sm:$0xff] }
  0xc2   :  { %1060 = vmatpush.msrb.mxu0 %v380_v4  ;;  %1079 = vmatpush.msrb.mxu1 %v397_v5  ;;  %v495_v4 = vld [vmem:[%s2985_s1 + $0xdb8] sm:$0xff]  ;;  %v445_v5 = vld [vmem:[%s2985_s1 + $0xc28] sm:$0xff] }
  0xc3   :  { %1100 = vmatpush.msrb.mxu2 %v412_v6  ;;  %1119 = vmatpush.msrb.mxu3 %v429_v7  ;;  %v462_v6 = vld [vmem:[%s2985_s1 + $0xcb0] sm:$0xff]  ;;  %v477_v7 = vld [vmem:[%s2985_s1 + $0xd28] sm:$0xff] }
  0xc4   :  { %1061 = vmatpush.msrb.mxu0 %v379_v8  ;;  %1080 = vmatpush.msrb.mxu1 %v396_v9  ;;  %v494_v8 = vld [vmem:[%s2985_s1 + $0xdb0] sm:$0xff]  ;;  %v444_v9 = vld [vmem:[%s2985_s1 + $0xc20] sm:$0xff] }
  0xc5   :  { %1101 = vmatpush.msrb.mxu2 %v411_v10  ;;  %1120 = vmatpush.msrb.mxu3 %v428_v11  ;;  %v461_v10 = vld [vmem:[%s2985_s1 + $0xca8] sm:$0xff]  ;;  %v476_v11 = vld [vmem:[%s2985_s1 + $0xd20] sm:$0xff] }
  0xc6   :  { %1062 = vmatpush.msrb.mxu0 %v378_v12  ;;  %1081 = vmatpush.msrb.mxu1 %v395_v13  ;;  %v493_v12 = vld [vmem:[%s2985_s1 + $0xda8] sm:$0xff]  ;;  %v443_v13 = vld [vmem:[%s2985_s1 + $0xc18] sm:$0xff] }
  0xc7   :  { %1102 = vmatpush.msrb.mxu2 %v410_v14  ;;  %1121 = vmatpush.msrb.mxu3 %v427_v15  ;;  %v460_v14 = vld [vmem:[%s2985_s1 + $0xca0] sm:$0xff]  ;;  %v475_v15 = vld [vmem:[%s2985_s1 + $0xd18] sm:$0xff] }
  0xc8   :  { %1063 = vmatpush.msrb.mxu0 %v377_v16  ;;  %1082 = vmatpush.msrb.mxu1 %v394_v17  ;;  %v492_v16 = vld [vmem:[%s2985_s1 + $0xda0] sm:$0xff]  ;;  %v442_v17 = vld [vmem:[%s2985_s1 + $0xc10] sm:$0xff] }
  0xc9   :  { %1103 = vmatpush.msrb.mxu2 %v409_v19  ;;  %1122 = vmatpush.msrb.mxu3 %v426_v20  ;;  %v474_v19 = vld [vmem:[%s2985_s1 + $0xd10] sm:$0xff]  ;;  %v491_v20 = vld [vmem:[%s2985_s1 + $0xd98] sm:$0xff] }
  0xca   :  { %1064 = vmatpush.msrb.mxu0 %v376_v21  ;;  %1083 = vmatpush.msrb.mxu1 %v393_v22  ;;  %v441_v21 = vld [vmem:[%s2985_s1 + $0xc08] sm:$0xff]  ;;  %v458_v22 = vld [vmem:[%s2985_s1 + $0xc90] sm:$0xff] }
  0xcb   :  { %1104 = vmatpush.msrb.mxu2 %v408_v23  ;;  %1123 = vmatpush.msrb.mxu3 %v425_v24  ;;  %v1321_v23 = vld [vmem:[%s2984_s0 + $0xb8] sm:$0xff]  ;;  %v473_v24 = vld [vmem:[%s2985_s1 + $0xd08] sm:$0xff]  ;;  %s1299_s0 = sshll.u32 %s2987_s3, 4  ;;  %s1300_s0 = int_to_ptr.hbm [resolvable:$true] %s1299_s0 }
  0xcc   :  { %1065 = vmatmul.f32.vlgmr.msrb.gmra.mxu0 %v603_v25  ;;  %1105 = vmatmul.f32.vlgmr.msrb.gmra.mxu2 %v605_v26  ;;  %v490_v25 = vld [vmem:[%s2985_s1 + $0xd90] sm:$0xff]  ;;  %608 = vst [vmem:[#allocation1 + $0x20] ss:$4 sm:$0xff] %v1321_v23  ;;  %v440_v26 = vld [vmem:[%s2985_s1 + $0xc00] sm:$0xff]  ;;  %v523_v23 = vld [vmem:[%s2985_s1 + $0xe98] sm:$0xff] }
  0xcd   :  { %1129 = vmatpush.msra.mxu0 %v455_v28  ;;  %1169 = vmatpush.msra.mxu2 %v487_v29  ;;  %v457_v28 = vld [vmem:[%s2985_s1 + $0xc88] sm:$0xff]  ;;  %v472_v29 = vld [vmem:[%s2985_s1 + $0xd00] sm:$0xff] }
  0xce   :  { %1084 = vmatpush.msrb.mxu1 %v392_v31  ;;  %1124 = vmatpush.msrb.mxu3 %v424_v27  ;;  %v489_v31 = vld [vmem:[%s2985_s1 + $0xd88] sm:$0xff]  ;;  %v609_v27 = vld.sshfl [vmem:[#allocation1] sm:$0xff pattern:$0x73625140] }
  0xcf   :  { %1085 = vmatmul.f32.vlgmr.msrb.gmra.mxu1 %v604_v32  ;;  %1125 = vmatmul.f32.vlgmr.msrb.gmra.mxu3 %v606_v30  ;;  %v611_v32 = vld.sshfl [vmem:[#allocation1 + $0x10] sm:$0xff pattern:$0x73625140]  ;;  %v519_v30 = vld [vmem:[%s2985_s1 + $0xe78] sm:$0xff] }
  0xd0   :  { %1130 = vmatpush.msra.mxu0 %v454_v33  ;;  %1149 = vmatpush.msra.mxu1 %v471_v34  ;;  %v551_v33 = vld [vmem:[%s2985_s1 + $0xf78] sm:$0xff]  ;;  %v456_v34 = vld [vmem:[%s2985_s1 + $0xc80] sm:$0xff] }
  0xd1   :  { %1170 = vmatpush.msra.mxu2 %v486_v35  ;;  %1189 = vmatpush.msra.mxu3 %v503_v36  ;;  %v488_v35 = vld [vmem:[%s2985_s1 + $0xd80] sm:$0xff]  ;;  %v610_v36 = vld.sshfl [vmem:[#allocation1 + $0x8] sm:$0xff pattern:$0x73625140] }
  0xd2   :  { %1131 = vmatpush.msra.mxu0 %v453_v37  ;;  %1150 = vmatpush.msra.mxu1 %v470_v38  ;;  %v612_v37 = vld.sshfl [vmem:[#allocation1 + $0x18] sm:$0xff pattern:$0x73625140]  ;;  %v518_v38 = vld [vmem:[%s2985_s1 + $0xe70] sm:$0xff] }
  0xd3   :  { %1171 = vmatpush.msra.mxu2 %v485_v39  ;;  %1190 = vmatpush.msra.mxu3 %v502_v40  ;;  %v535_v39 = vld [vmem:[%s2985_s1 + $0xef8] sm:$0xff]  ;;  %v550_v40 = vld [vmem:[%s2985_s1 + $0xf70] sm:$0xff] }
  0xd4   :  { %1132 = vmatpush.msra.mxu0 %v452_v41  ;;  %1151 = vmatpush.msra.mxu1 %v469_v42  ;;  %v567_v41 = vld [vmem:[%s2985_s1 + $0xff8] sm:$0xff]  ;;  %v517_v42 = vld [vmem:[%s2985_s1 + $0xe68] sm:$0xff] }
  0xd5   :  { %1172 = vmatpush.msra.mxu2 %v484_v43  ;;  %1191 = vmatpush.msra.mxu3 %v501_v44  ;;  %v534_v43 = vld [vmem:[%s2985_s1 + $0xef0] sm:$0xff]  ;;  %v549_v44 = vld [vmem:[%s2985_s1 + $0xf68] sm:$0xff] }
  0xd6   :  { %1133 = vmatpush.msra.mxu0 %v451_v45  ;;  %1152 = vmatpush.msra.mxu1 %v468_v46  ;;  %v566_v45 = vld [vmem:[%s2985_s1 + $0xff0] sm:$0xff]  ;;  %v516_v46 = vld [vmem:[%s2985_s1 + $0xe60] sm:$0xff] }
  0xd7   :  { %1173 = vmatpush.msra.mxu2 %v483_v47  ;;  %1192 = vmatpush.msra.mxu3 %v500_v48  ;;  %v533_v47 = vld [vmem:[%s2985_s1 + $0xee8] sm:$0xff]  ;;  %v548_v48 = vld [vmem:[%s2985_s1 + $0xf60] sm:$0xff] }
  0xd8   :  { %1134 = vmatpush.msra.mxu0 %v450_v49  ;;  %1153 = vmatpush.msra.mxu1 %v467_v50  ;;  %v565_v49 = vld [vmem:[%s2985_s1 + $0xfe8] sm:$0xff]  ;;  %v515_v50 = vld [vmem:[%s2985_s1 + $0xe58] sm:$0xff] }
  0xd9   :  { %1174 = vmatpush.msra.mxu2 %v482_v51  ;;  %1193 = vmatpush.msra.mxu3 %v499_v52  ;;  %v532_v51 = vld [vmem:[%s2985_s1 + $0xee0] sm:$0xff]  ;;  %v547_v52 = vld [vmem:[%s2985_s1 + $0xf58] sm:$0xff] }
  0xda   :  { %1135 = vmatpush.msra.mxu0 %v449_v53  ;;  %1154 = vmatpush.msra.mxu1 %v466_v54  ;;  %v564_v53 = vld [vmem:[%s2985_s1 + $0xfe0] sm:$0xff]  ;;  %v514_v54 = vld [vmem:[%s2985_s1 + $0xe50] sm:$0xff] }
  0xdb   :  { %1175 = vmatpush.msra.mxu2 %v481_v55  ;;  %1194 = vmatpush.msra.mxu3 %v498_v56  ;;  %v531_v55 = vld [vmem:[%s2985_s1 + $0xed8] sm:$0xff]  ;;  %v546_v56 = vld [vmem:[%s2985_s1 + $0xf50] sm:$0xff] }
  0xdc   :  { %1136 = vmatpush.msra.mxu0 %v448_v57  ;;  %1155 = vmatpush.msra.mxu1 %v465_v58  ;;  %v563_v57 = vld [vmem:[%s2985_s1 + $0xfd8] sm:$0xff]  ;;  %v513_v58 = vld [vmem:[%s2985_s1 + $0xe48] sm:$0xff] }
  0xdd   :  { %1176 = vmatpush.msra.mxu2 %v480_v59  ;;  %1195 = vmatpush.msra.mxu3 %v497_v60  ;;  %v530_v59 = vld [vmem:[%s2985_s1 + $0xed0] sm:$0xff]  ;;  %v545_v60 = vld [vmem:[%s2985_s1 + $0xf48] sm:$0xff] }
  0xde   :  { %1137 = vmatpush.msra.mxu0 %v447_v61  ;;  %1156 = vmatpush.msra.mxu1 %v464_v62  ;;  %v562_v61 = vld [vmem:[%s2985_s1 + $0xfd0] sm:$0xff]  ;;  %v512_v62 = vld [vmem:[%s2985_s1 + $0xe40] sm:$0xff] }
  0xdf   :  { %1177 = vmatpush.msra.mxu2 %v479_v63  ;;  %1196 = vmatpush.msra.mxu3 %v496_v0  ;;  %v529_v63 = vld [vmem:[%s2985_s1 + $0xec8] sm:$0xff]  ;;  %v544_v0 = vld [vmem:[%s2985_s1 + $0xf40] sm:$0xff] }
  0xe0   :  { %1138 = vmatpush.msra.mxu0 %v446_v1  ;;  %1157 = vmatpush.msra.mxu1 %v463_v2  ;;  %v561_v1 = vld [vmem:[%s2985_s1 + $0xfc8] sm:$0xff]  ;;  %v511_v2 = vld [vmem:[%s2985_s1 + $0xe38] sm:$0xff] }
  0xe1   :  { %1178 = vmatpush.msra.mxu2 %v478_v3  ;;  %1197 = vmatpush.msra.mxu3 %v495_v4  ;;  %v528_v3 = vld [vmem:[%s2985_s1 + $0xec0] sm:$0xff]  ;;  %v543_v4 = vld [vmem:[%s2985_s1 + $0xf38] sm:$0xff] }
  0xe2   :  { %1139 = vmatpush.msra.mxu0 %v445_v5  ;;  %1158 = vmatpush.msra.mxu1 %v462_v6  ;;  %v560_v5 = vld [vmem:[%s2985_s1 + $0xfc0] sm:$0xff]  ;;  %v510_v6 = vld [vmem:[%s2985_s1 + $0xe30] sm:$0xff] }
  0xe3   :  { %1179 = vmatpush.msra.mxu2 %v477_v7  ;;  %1198 = vmatpush.msra.mxu3 %v494_v8  ;;  %v527_v7 = vld [vmem:[%s2985_s1 + $0xeb8] sm:$0xff]  ;;  %v542_v8 = vld [vmem:[%s2985_s1 + $0xf30] sm:$0xff] }
  0xe4   :  { %1140 = vmatpush.msra.mxu0 %v444_v9  ;;  %1159 = vmatpush.msra.mxu1 %v461_v10  ;;  %v559_v9 = vld [vmem:[%s2985_s1 + $0xfb8] sm:$0xff]  ;;  %v509_v10 = vld [vmem:[%s2985_s1 + $0xe28] sm:$0xff] }
  0xe5   :  { %1180 = vmatpush.msra.mxu2 %v476_v11  ;;  %1199 = vmatpush.msra.mxu3 %v493_v12  ;;  %v526_v11 = vld [vmem:[%s2985_s1 + $0xeb0] sm:$0xff]  ;;  %v541_v12 = vld [vmem:[%s2985_s1 + $0xf28] sm:$0xff] }
  0xe6   :  { %1141 = vmatpush.msra.mxu0 %v443_v13  ;;  %1160 = vmatpush.msra.mxu1 %v460_v14  ;;  %v558_v13 = vld [vmem:[%s2985_s1 + $0xfb0] sm:$0xff]  ;;  %v508_v14 = vld [vmem:[%s2985_s1 + $0xe20] sm:$0xff] }
  0xe7   :  { %1181 = vmatpush.msra.mxu2 %v475_v15  ;;  %1200 = vmatpush.msra.mxu3 %v492_v16  ;;  %v525_v15 = vld [vmem:[%s2985_s1 + $0xea8] sm:$0xff]  ;;  %v540_v16 = vld [vmem:[%s2985_s1 + $0xf20] sm:$0xff] }
  0xe8   :  { %1142 = vmatpush.msra.mxu0 %v442_v17  ;;  %1161 = vmatpush.msra.mxu1 %v459_v18  ;;  %v557_v17 = vld [vmem:[%s2985_s1 + $0xfa8] sm:$0xff]  ;;  %v507_v18 = vld [vmem:[%s2985_s1 + $0xe18] sm:$0xff] }
  0xe9   :  { %1182 = vmatpush.msra.mxu2 %v474_v19  ;;  %1201 = vmatpush.msra.mxu3 %v491_v20  ;;  %v524_v19 = vld [vmem:[%s2985_s1 + $0xea0] sm:$0xff]  ;;  %v539_v20 = vld [vmem:[%s2985_s1 + $0xf18] sm:$0xff] }
  0xea   :  { %1143 = vmatpush.msra.mxu0 %v441_v21  ;;  %1162 = vmatpush.msra.mxu1 %v458_v22  ;;  %v556_v21 = vld [vmem:[%s2985_s1 + $0xfa0] sm:$0xff]  ;;  %v506_v22 = vld [vmem:[%s2985_s1 + $0xe10] sm:$0xff] }
  0xeb   :  { %1183 = vmatpush.msra.mxu2 %v473_v24  ;;  %1202 = vmatpush.msra.mxu3 %v490_v25  ;;  %v538_v24 = vld [vmem:[%s2985_s1 + $0xf10] sm:$0xff]  ;;  %v555_v25 = vld [vmem:[%s2985_s1 + $0xf98] sm:$0xff] }
  0xec   :  { %1144 = vmatpush.msra.mxu0 %v440_v26  ;;  %1163 = vmatpush.msra.mxu1 %v457_v28  ;;  %v505_v26 = vld [vmem:[%s2985_s1 + $0xe08] sm:$0xff]  ;;  %v522_v28 = vld [vmem:[%s2985_s1 + $0xe90] sm:$0xff] }
  0xed   :  { %1184 = vmatpush.msra.mxu2 %v472_v29  ;;  %1203 = vmatpush.msra.mxu3 %v489_v31  ;;  %v537_v29 = vld [vmem:[%s2985_s1 + $0xf08] sm:$0xff]  ;;  %v554_v31 = vld [vmem:[%s2985_s1 + $0xf90] sm:$0xff] }
  0xee   :  { %1145 = vmatmul.f32.vlgmr.msra.gmra.mxu0 %v609_v27  ;;  %1185 = vmatmul.f32.vlgmr.msra.gmra.mxu2 %v611_v32  ;;  %v504_v27 = vld [vmem:[%s2985_s1 + $0xe00] sm:$0xff]  ;;  %v521_v32 = vld [vmem:[%s2985_s1 + $0xe88] sm:$0xff] }
  0xef   :  { %1209 = vmatpush.msrb.mxu0 %v519_v30  ;;  %1249 = vmatpush.msrb.mxu2 %v551_v33  ;;  %v536_v30 = vld [vmem:[%s2985_s1 + $0xf00] sm:$0xff]  ;;  %v553_v33 = vld [vmem:[%s2985_s1 + $0xf88] sm:$0xff] }
  0xf0   :  { %1164 = vmatpush.msra.mxu1 %v456_v34  ;;  %1204 = vmatpush.msra.mxu3 %v488_v35  ;;  %v613_v34 = vld.sshfl [vmem:[#allocation1 + $0x20] sm:$0xff pattern:$0x73625140]  ;;  %v615_v35 = vld.sshfl [vmem:[#allocation1 + $0x30] sm:$0xff pattern:$0x73625140] }
  0xf1   :  { %1165 = vmatmul.f32.vlgmr.msra.gmra.mxu1 %v610_v36  ;;  %1205 = vmatmul.f32.vlgmr.msra.gmra.mxu3 %v612_v37  ;;  %v520_v36 = vld [vmem:[%s2985_s1 + $0xe80] sm:$0xff] }
  0xf2   :  { %1210 = vmatpush.msrb.mxu0 %v518_v38  ;;  %1229 = vmatpush.msrb.mxu1 %v535_v39  ;;  %v552_v37 = vld [vmem:[%s2985_s1 + $0xf80] sm:$0xff]  ;;  %v614_v38 = vld.sshfl [vmem:[#allocation1 + $0x28] sm:$0xff pattern:$0x73625140] }
  0xf3   :  { %1250 = vmatpush.msrb.mxu2 %v550_v40  ;;  %1269 = vmatpush.msrb.mxu3 %v567_v41  ;;  %v616_v39 = vld.sshfl [vmem:[#allocation1 + $0x38] sm:$0xff pattern:$0x73625140]  ;;  %v686_v40 = vpop.f32.mrf.mxu1  ;;  %v666_v41 = vpop.f32.mrf.mxu0 }
  0xf4   :  { %1211 = vmatpush.msrb.mxu0 %v517_v42  ;;  %1230 = vmatpush.msrb.mxu1 %v534_v43  ;;  %v687_v42 = vadd.f32 %v686_v40, %v666_v41  ;;  %v706_v43 = vpop.f32.mrf.mxu2 }
  0xf5   :  { %1251 = vmatpush.msrb.mxu2 %v549_v44  ;;  %1270 = vmatpush.msrb.mxu3 %v566_v45  ;;  %v726_v45 = vpop.f32.mrf.mxu3 }
  0xf6   :  { %1212 = vmatpush.msrb.mxu0 %v516_v46  ;;  %1231 = vmatpush.msrb.mxu1 %v533_v47  ;;  %v707_v44 = vadd.f32 %v706_v43, %v687_v42 }
  0xf7   :  { %1252 = vmatpush.msrb.mxu2 %v548_v48  ;;  %1271 = vmatpush.msrb.mxu3 %v565_v49 }
  0xf8   :  { %1213 = vmatpush.msrb.mxu0 %v515_v50  ;;  %1232 = vmatpush.msrb.mxu1 %v532_v51  ;;  %v727_v46 = vadd.f32 %v726_v45, %v707_v44 }
  0xf9   :  { %1253 = vmatpush.msrb.mxu2 %v547_v52  ;;  %1272 = vmatpush.msrb.mxu3 %v564_v53 }
  0xfa   :  { %1214 = vmatpush.msrb.mxu0 %v514_v54  ;;  %1233 = vmatpush.msrb.mxu1 %v531_v55 }
  0xfb   :  { %1254 = vmatpush.msrb.mxu2 %v546_v56  ;;  %1273 = vmatpush.msrb.mxu3 %v563_v57  ;;  %v746_v47 = vpop.f32.mrf.mxu0  ;;  %v766_v49 = vpop.f32.mrf.mxu1 }
  0xfc   :  { %1215 = vmatpush.msrb.mxu0 %v513_v58  ;;  %1234 = vmatpush.msrb.mxu1 %v530_v59  ;;  %v747_v48 = vadd.f32 %v746_v47, %v727_v46  ;;  %v786_v51 = vpop.f32.mrf.mxu2 }
  0xfd   :  { %1255 = vmatpush.msrb.mxu2 %v545_v60  ;;  %1274 = vmatpush.msrb.mxu3 %v562_v61  ;;  %v806_v53 = vpop.f32.mrf.mxu3 }
  0xfe   :  { %1216 = vmatpush.msrb.mxu0 %v512_v62  ;;  %1235 = vmatpush.msrb.mxu1 %v529_v63  ;;  %v767_v50 = vadd.f32 %v766_v49, %v747_v48 }
  0xff   :  { %1256 = vmatpush.msrb.mxu2 %v544_v0  ;;  %1275 = vmatpush.msrb.mxu3 %v561_v1 }
 0x100   :  { %1217 = vmatpush.msrb.mxu0 %v511_v2  ;;  %1236 = vmatpush.msrb.mxu1 %v528_v3  ;;  %v787_v52 = vadd.f32 %v786_v51, %v767_v50 }
 0x101   :  { %1257 = vmatpush.msrb.mxu2 %v543_v4  ;;  %1276 = vmatpush.msrb.mxu3 %v560_v5 }
 0x102   :  { %1218 = vmatpush.msrb.mxu0 %v510_v6  ;;  %1237 = vmatpush.msrb.mxu1 %v527_v7  ;;  %v807_v55 = vadd.f32 %v806_v53, %v787_v52 }
 0x103   :  { %1258 = vmatpush.msrb.mxu2 %v542_v8  ;;  %1277 = vmatpush.msrb.mxu3 %v559_v9  ;;  %v826_v54 = vpop.f32.mrf.mxu0  ;;  %v846_v57 = vpop.f32.mrf.mxu1 }
 0x104   :  { %1219 = vmatpush.msrb.mxu0 %v509_v10  ;;  %1238 = vmatpush.msrb.mxu1 %v526_v11  ;;  %v827_v56 = vadd.f32 %v826_v54, %v807_v55  ;;  %v866_v58 = vpop.f32.mrf.mxu2 }
 0x105   :  { %1259 = vmatpush.msrb.mxu2 %v541_v12  ;;  %1278 = vmatpush.msrb.mxu3 %v558_v13  ;;  %v886_v61 = vpop.f32.mrf.mxu3  ;;  %v1323_v12 = vld [vmem:[%s2986_s2] ss:$0 sm:$0xff]  ;;  %s1350_s2 = smov [#allocation2]  }
 0x106   :  { %1220 = vmatpush.msrb.mxu0 %v508_v14  ;;  %1239 = vmatpush.msrb.mxu1 %v525_v15  ;;  %v847_v59 = vadd.f32 %v846_v57, %v827_v56  ;;  %46 = vst.msk [vmem:[#allocation2] sm:$0x3] %vm45_vm0, %v1323_v12  ;;  %s1297_s22 = sshll.u32 %s1350_s2, 4  ;;  %s1298_s22 = int_to_ptr.vmem [resolvable:$true] %s1297_s22 }
 0x107   :  { %1260 = vmatpush.msrb.mxu2 %v540_v16  ;;  %1279 = vmatpush.msrb.mxu3 %v557_v17 }
 0x108   :  { %1221 = vmatpush.msrb.mxu0 %v507_v18  ;;  %1240 = vmatpush.msrb.mxu1 %v524_v19  ;;  %v867_v60 = vadd.f32 %v866_v58, %v847_v59 }
 0x109   :  { %1261 = vmatpush.msrb.mxu2 %v539_v20  ;;  %1280 = vmatpush.msrb.mxu3 %v556_v21 }
 0x10a   :  { %1222 = vmatpush.msrb.mxu0 %v506_v22  ;;  %1241 = vmatpush.msrb.mxu1 %v523_v23  ;;  %v887_v63 = vadd.f32 %v886_v61, %v867_v60 }
 0x10b   :  { %1262 = vmatpush.msrb.mxu2 %v538_v24  ;;  %1281 = vmatpush.msrb.mxu3 %v555_v25  ;;  %v906_v62 = vpop.f32.mrf.mxu0  ;;  %v926_v1 = vpop.f32.mrf.mxu1 }
 0x10c   :  { %1223 = vmatpush.msrb.mxu0 %v505_v26  ;;  %1242 = vmatpush.msrb.mxu1 %v522_v28  ;;  %v907_v0 = vadd.f32 %v906_v62, %v887_v63  ;;  %v946_v2 = vpop.f32.mrf.mxu2 }
 0x10d   :  { %1263 = vmatpush.msrb.mxu2 %v537_v29  ;;  %1282 = vmatpush.msrb.mxu3 %v554_v31 }
 0x10e   :  { %1224 = vmatpush.msrb.mxu0 %v504_v27  ;;  %1243 = vmatpush.msrb.mxu1 %v521_v32  ;;  %v927_v3 = vadd.f32 %v926_v1, %v907_v0  ;;  %v966_v5 = vpop.f32.mrf.mxu3 }
 0x10f   :  { %1264 = vmatpush.msrb.mxu2 %v536_v30  ;;  %1283 = vmatpush.msrb.mxu3 %v553_v33 }
 0x110   :  { %1225 = vmatmul.f32.vlgmr.msrb.gmra.mxu0 %v613_v34  ;;  %1265 = vmatmul.f32.vlgmr.msrb.gmra.mxu2 %v615_v35  ;;  %v947_v4 = vadd.f32 %v946_v2, %v927_v3 }
 0x111   :  { %1244 = vmatpush.msrb.mxu1 %v520_v36  ;;  %1284 = vmatpush.msrb.mxu3 %v552_v37 }
 0x112   :  { %1245 = vmatmul.f32.vlgmr.msrb.gmra.mxu1 %v614_v38  ;;  %1285 = vmatmul.f32.vlgmr.msrb.gmra.mxu3 %v616_v39  ;;  %v967_v7 = vadd.f32 %v966_v5, %v947_v4  ;;  %v47_v38 = vld [vmem:[#allocation2] sm:$0x3] }
 0x127   :  { %v986_v6 = vpop.f32.mrf.mxu0 }
 0x128   :  { %v987_v8 = vadd.f32 %v986_v6, %v967_v7 }
 0x12a   :  { %v1006_v9 = vpop.f32.mrf.mxu1 }
 0x12b   :  { %v1007_v11 = vadd.f32 %v1006_v9, %v987_v8 }
 0x12d   :  { %v1026_v10 = vpop.f32.mrf.mxu2 }
 0x12e   :  { %v1027_v13 = vadd.f32 %v1026_v10, %v1007_v11 }
 0x130   :  { %v1046_v14 = vpop.f32.mrf.mxu3 }
 0x131   :  { %v1047_v16 = vadd.f32 %v1046_v14, %v1027_v13 }
 0x149   :  { %v1066_v15 = vpop.f32.mrf.mxu0 }
 0x14a   :  { %v1067_v17 = vadd.f32 %v1066_v15, %v1047_v16 }
 0x14c   :  { %v1086_v18 = vpop.f32.mrf.mxu1 }
 0x14d   :  { %v1087_v20 = vadd.f32 %v1086_v18, %v1067_v17 }
 0x14f   :  { %v1106_v19 = vpop.f32.mrf.mxu2 }
 0x150   :  { %v1107_v21 = vadd.f32 %v1106_v19, %v1087_v20 }
 0x152   :  { %v1126_v22 = vpop.f32.mrf.mxu3 }
 0x153   :  { %v1127_v24 = vadd.f32 %v1126_v22, %v1107_v21 }
 0x16b   :  { %v1146_v23 = vpop.f32.mrf.mxu0 }
 0x16c   :  { %v1147_v25 = vadd.f32 %v1146_v23, %v1127_v24 }
 0x16e   :  { %v1166_v26 = vpop.f32.mrf.mxu1 }
 0x16f   :  { %v1167_v29 = vadd.f32 %v1166_v26, %v1147_v25 }
 0x171   :  { %v1186_v28 = vpop.f32.mrf.mxu2 }
 0x172   :  { %v1187_v31 = vadd.f32 %v1186_v28, %v1167_v29 }
 0x174   :  { %v1206_v27 = vpop.f32.mrf.mxu3 }
 0x175   :  { %v1207_v32 = vadd.f32 %v1206_v27, %v1187_v31 }
 0x18d   :  { %v1226_v30 = vpop.f32.mrf.mxu0 }
 0x18e   :  { %v1227_v33 = vadd.f32 %v1226_v30, %v1207_v32 }
 0x18f   :  { %v1246_v34 = vpop.f32.mrf.mxu1 }
 0x190   :  { %v1247_v35 = vadd.f32 %v1246_v34, %v1227_v33 }
 0x193   :  { %v1266_v36 = vpop.f32.mrf.mxu2 }
 0x194   :  { %v1267_v37 = vadd.f32 %v1266_v36, %v1247_v35 }
 0x195   :  { %v1286_v39 = vpop.f32.mrf.mxu3 }
 0x196   :  { %v1287_v40 = vadd.f32 %v1286_v39, %v1267_v37 }
 0x198   :  { %v1289_v41 = vadd.f32 %v1287_v40, %v47_v38 }
 0x19a   :  { %1291 = vst.msk [vmem:[#allocation2] sm:$0x3] %vm45_vm0, %v1289_v41 }
 0x19b   :  { %1302 = dma.vmem_to_hbm [thread:$0]  %s1298_s22, 32, %s1300_s0, [#allocation3]  }
 0x19c   :  { %1348 = dma.done.wait [#allocation3], 32  }
 0x19d   :  { %1349 = vsyncadd [#allocation3], 4294967264 }
 0x19e   :  { %1307 = vsyncpa [#allocation3], 1 }

</bundles_post_ra>
